<compile_context>
chip_gen: v6e
topology: v6e:2x2x1
jax: 0.10.0
libtpu: 0.0.40
codegen_flags: <defaults>
</compile_context>

<pallas_src>
import functools

import jax
import jax.numpy as jnp
from jax import lax
from jax.experimental import pallas as pl
from jax.experimental.pallas import tpu as pltpu


_LANE = 128
_SUBLANE = 8
_VMEM_LIMIT_BYTES = 48 * 1024 * 1024   # scoped-VMEM request (<= v7x 64 MiB physical)
_VMEM_BUDGET_BYTES = 28 * 1024 * 1024  # tile-sizing budget (headroom under the limit)
_MAX_TILE_N = 4096


def _round_up(x, m):
    return ((x + m - 1) // m) * m


def _gabor_kernel(xt_ref, rhs_ref, *o_refs, fp, out_slices):
    # xt_ref : (cin_pad, tile_n)   augmented, transposed coordinates
    # rhs_ref: (cin_pad, 2*fp)     fused [sin | exp] parameter matrix
    # o_refs : one (tile_n, width) ref per entry in out_slices (static, 128-aligned)
    xt = xt_ref[...]
    rhs = rhs_ref[...]
    # Single MXU matmul yields BOTH pre-activations:
    #   combined[:, :fp] = x @ W^T + b
    #   combined[:, fp:] = -0.5 * gamma * ||x - mu||^2   (expanded form)
    combined = lax.dot_general(
        xt, rhs, dimension_numbers=(((0,), (0,)), ((), ())),
        preferred_element_type=jnp.float32)                       # (tile_n, 2*fp)
    scale = jnp.sin(combined[:, :fp]) * jnp.exp(combined[:, fp:])
    for o_ref, (start, width) in zip(o_refs, out_slices):
        o_ref[...] = scale[:, start:start + width].astype(o_ref.dtype)


def _choose_tile_n(n_points, cin_pad, fp):
    """Pick tile_n from a VMEM budget including MXU-result / elementwise temps."""
    # Grid-invariant fused RHS, double-buffered.
    fixed = 4 * 2 * cin_pad * (2 * fp)
    # Per point: x^T column (cin_pad sublanes, x2 buffers), output lanes
    # (fp, x2 buffers), and ~4*fp f32 of intermediates (combined / sin / exp /
    # product) that Mosaic must materialize.
    per_row = 4 * (2 * cin_pad + 2 * fp + 4 * fp)
    t = max((_VMEM_BUDGET_BYTES - fixed) // per_row, _LANE)
    t = min(t, _MAX_TILE_N)
    # Keep >= ~4 grid steps when N allows (v7x megacore split + pipelining).
    t = min(t, max(_LANE, _round_up(-(-n_points // 4), _LANE)))
    return max((t // _LANE) * _LANE, _LANE)


def _pad_tail(a, fp):
    """Zero-pad the leading (feature) axis of `a` up to length fp."""
    f = a.shape[0]
    if f == fp:
        return a
    pad = [(0, fp - f)] + [(0, 0)] * (a.ndim - 1)
    return jnp.pad(a, pad)


@functools.partial(jax.jit, static_argnames=("n_layers", "tile_n"))
def gabor_injection_forward(x, w, b, mu, gamma, *, n_layers=1, tile_n=None):
    """GaborInjection forward.

    x: (N, Cin) coordinate points (a leading batch dim of 1 is squeezed, like
       x.squeeze(0) in the PyTorch module); w: (F, Cin); b: (F,); mu: (F, Cin);
       gamma: (F,) with F = interm_channels * n_layers.
    Returns a tuple of n_layers arrays, each (N, F // n_layers), identical to
    torch.chunk(scale, n_layers, dim=-1).
    """
    if x.ndim == 3 and x.shape[0] == 1:
        x = x[0]
    N, cin = x.shape
    F = w.shape[0]
    assert F % n_layers == 0, "interm_channels*n_layers must divide by n_layers"
    interm = F // n_layers

    # Lane layout of the fused per-half output width:
    #   interm % 128 == 0 -> one lane-dense output per layer (no padding).
    #   otherwise         -> one fused lane-dense output of round_up(F, 128)
    #                        lanes; chunk split is a static slice downstream.
    per_layer_out = (interm % _LANE == 0)
    fp = F if per_layer_out else _round_up(F, _LANE)

    cin_aug = cin + 2                                   # [x, ||x||^2, 1]
    cin_pad = max(_round_up(cin_aug, _SUBLANE), _SUBLANE)

    if tile_n is None:
        tile_n = _choose_tile_n(N, cin_pad, fp)
    else:
        # Validate / round caller-supplied tile_n instead of trusting it.
        tile_n = max(_round_up(int(tile_n), _LANE), _LANE)
        tile_n = min(tile_n, _round_up(N, _LANE))
    grid_n = pl.cdiv(N, tile_n)
    n_pad = grid_n * tile_n

    f32 = jnp.float32
    x = x.astype(f32)
    w_p = _pad_tail(w.astype(f32), fp)                  # (fp, cin)
    b_p = _pad_tail(b.astype(f32), fp)                  # (fp,)
    mu_p = _pad_tail(mu.astype(f32), fp)                # (fp, cin)
    g_p = _pad_tail(gamma.astype(f32), fp)              # (fp,)
    mu_sq = jnp.sum(mu_p * mu_p, axis=-1)               # (fp,)

    # Fused RHS: columns [sin-half | exp-half], rows follow xa's columns.
    zrow = jnp.zeros((1, fp), f32)
    tail = jnp.zeros((cin_pad - cin_aug, fp), f32)
    rhs_sin = jnp.concatenate([w_p.T, zrow, b_p[None, :], tail], axis=0)
    rhs_exp = jnp.concatenate([(mu_p * g_p[:, None]).T,
                               (-0.5 * g_p)[None, :],
                               (-0.5 * g_p * mu_sq)[None, :],
                               tail], axis=0)
    rhs = jnp.concatenate([rhs_sin, rhs_exp], axis=1)   # (cin_pad, 2*fp)

    # Augment, pad and transpose x once in the wrapper; the x tile then sits
    # sublane-packed in VMEM (no cin -> 128 lane padding), DMA rows contiguous.
    x_sq = jnp.sum(x * x, axis=-1, keepdims=True)
    xa = jnp.concatenate(
        [x, x_sq, jnp.ones((N, 1), f32),
         jnp.zeros((N, cin_pad - cin_aug), f32)], axis=1)          # (N, cin_pad)
    if n_pad != N:
        xa = jnp.pad(xa, ((0, n_pad - N), (0, 0)))
    xt = xa.T                                                       # (cin_pad, n_pad)

    if per_layer_out:
        out_slices = tuple((l * interm, interm) for l in range(n_layers))
        out_shape = tuple(jax.ShapeDtypeStruct((n_pad, interm), f32)
                          for _ in range(n_layers))
        out_specs = tuple(pl.BlockSpec((tile_n, interm), lambda i: (i, 0))
                          for _ in range(n_layers))
    else:
        out_slices = ((0, fp),)
        out_shape = jax.ShapeDtypeStruct((n_pad, fp), f32)
        out_specs = pl.BlockSpec((tile_n, fp), lambda i: (i, 0))

    kernel = functools.partial(_gabor_kernel, fp=fp, out_slices=out_slices)

    cost = pl.CostEstimate(
        flops=2 * n_pad * cin_pad * 2 * fp,
        transcendentals=2 * n_pad * fp,
        bytes_accessed=4 * (n_pad * cin_pad + cin_pad * 2 * fp + n_pad * fp))

    res = pl.pallas_call(
        kernel,
        out_shape=out_shape,
        grid_spec=pltpu.PrefetchScalarGridSpec(
            num_scalar_prefetch=0,
            grid=(grid_n,),
            in_specs=[
                pl.BlockSpec((cin_pad, tile_n), lambda i: (0, i)),   # x^T tile
                pl.BlockSpec((cin_pad, 2 * fp), lambda i: (0, 0)),   # fused RHS (invariant)
            ],
            out_specs=out_specs,
        ),
        compiler_params=pltpu.CompilerParams(
            dimension_semantics=("parallel",),
            vmem_limit_bytes=_VMEM_LIMIT_BYTES),
        cost_estimate=cost,
    )(xt, rhs)

    if per_layer_out:
        outs = tuple(res) if isinstance(res, (tuple, list)) else (res,)
        if n_pad != N:
            outs = tuple(o[:N] for o in outs)
        return outs
    # Fused output: static chunk split (and N-padding strip) in the wrapper.
    return tuple(res[:N, l * interm:(l + 1) * interm] for l in range(n_layers))


def init_gabor_params(key, in_channels, interm_channels, scale=1.0,
                      alpha=5.0, beta=1.0, n_layers=1):
    """Deterministic synthetic init mirroring GaborInjection.__init__ shapes."""
    F = interm_channels * n_layers
    k_w, k_b, k_mu, k_g = jax.random.split(key, 4)
    # gamma ~ Gamma(alpha, rate=beta)
    gamma = jax.random.gamma(k_g, alpha, (F,), dtype=jnp.float32) / beta
    # mu ~ U(-1, 1)
    mu = jax.random.uniform(k_mu, (F, in_channels), jnp.float32, -1.0, 1.0)
    # Linear weight: torch default U(-1/sqrt(in), 1/sqrt(in)), scaled by scale*sqrt(gamma).
    bound = 1.0 / jnp.sqrt(jnp.float32(in_channels))
    w = jax.random.uniform(k_w, (F, in_channels), jnp.float32, -bound, bound)
    w = w * (scale * jnp.sqrt(gamma)[:, None])
    # bias ~ U(-pi, pi)
    b = jax.random.uniform(k_b, (F,), jnp.float32, -jnp.pi, jnp.pi)
    return w, b, mu, gamma


def _reference(x, w, b, mu, gamma, n_layers):
    periodic = jnp.sin(x @ w.T + b[None, :])
    d2 = jnp.sum((x[:, None, :] - mu[None, :, :]) ** 2, axis=-1)
    local = jnp.exp(-0.5 * gamma[None, :] * d2)
    return tuple(jnp.split(periodic * local, n_layers, axis=-1))


if __name__ == "__main__":
    key = jax.random.PRNGKey(0)
    k_x, k_p, k_x2, k_p2 = jax.random.split(key, 4)

    # --- Path 1: interm=32 (not 128-aligned) -> fused output + wrapper split.
    in_channels, interm_channels, n_layers, N = 4, 32, 2, 256
    x = jax.random.normal(k_x, (N, in_channels), jnp.float32)
    w, b, mu, gamma = init_gabor_params(
        k_p, in_channels, interm_channels, scale=1.0, alpha=5.0, beta=1.0,
        n_layers=n_layers)
    outs = jax.block_until_ready(
        gabor_injection_forward(x, w, b, mu, gamma, n_layers=n_layers))
    refs = _reference(x, w, b, mu, gamma, n_layers)
    assert len(outs) == n_layers
    for o, r in zip(outs, refs):
        assert o.shape == r.shape, (o.shape, r.shape)
        assert jnp.allclose(o, r, atol=1e-4, rtol=1e-4), \
            float(jnp.max(jnp.abs(o - r)))

    # --- Path 2: interm=128 (lane-aligned) per-layer outputs, odd N (padding).
    in2, int2, nl2, N2 = 3, 128, 1, 300
    x2 = jax.random.uniform(k_x2, (N2, in2), jnp.float32, -1.0, 1.0)
    w2, b2, mu2, g2 = init_gabor_params(k_p2, in2, int2, n_layers=nl2)
    outs2 = jax.block_until_ready(
        gabor_injection_forward(x2, w2, b2, mu2, g2, n_layers=nl2))
    refs2 = _reference(x2, w2, b2, mu2, g2, nl2)
    assert len(outs2) == nl2
    for o, r in zip(outs2, refs2):
        assert o.shape == r.shape, (o.shape, r.shape)
        assert jnp.allclose(o, r, atol=1e-4, rtol=1e-4), \
            float(jnp.max(jnp.abs(o - r)))

    print("KERNEL_OK")
</pallas_src>

<mosaic_0001>
module attributes {stable_mosaic.version = 11 : i64} {
  func.func @_gabor_kernel(%arg0: i32, %arg1: memref<8x128xf32, #tpu.memory_space<vmem>>, %arg2: memref<8x256xf32, #tpu.memory_space<vmem>>, %arg3: memref<128x128xf32, #tpu.memory_space<vmem>>) attributes {dimension_semantics = [#tpu.dimension_semantics<parallel>], iteration_bounds = array<i64: 2>, scalar_prefetch = 0 : i64, scratch_operands = 0 : i64, tpu.core_type = #tpu.core_type<tc>, window_params = [{transform_indices = @transform_0, window_bounds = array<i64: 8, 128>}, {pipeline_mode = #tpu.pipeline_mode<synchronous>, transform_indices = @transform_1, window_bounds = array<i64: 8, 256>}, {transform_indices = @transform_2, window_bounds = array<i64: 128, 128>}]} {
    %c0 = arith.constant 0 : index
    %c0_0 = arith.constant 0 : index
    %0 = vector.load %arg1[%c0, %c0_0] : memref<8x128xf32, #tpu.memory_space<vmem>>, vector<8x128xf32>
    %c0_1 = arith.constant 0 : index
    %c0_2 = arith.constant 0 : index
    %1 = vector.load %arg2[%c0_1, %c0_2] : memref<8x256xf32, #tpu.memory_space<vmem>>, vector<8x256xf32>
    %cst = arith.constant dense<0.000000e+00> : vector<128x256xf32>
    %2 = tpu.matmul %0, %1, %cst {dimension_numbers = #tpu.dot_dimension_numbers<[0], [0], [1], [1], [0, 1, 1, 1], [], []>} : vector<8x128xf32>, vector<8x256xf32>, vector<128x256xf32> -> vector<128x256xf32>
    %3 = vector.extract_strided_slice %2 {offsets = [0, 0], sizes = [128, 128], strides = [1, 1]} : vector<128x256xf32> to vector<128x128xf32>
    %4 = math.sin %3 : vector<128x128xf32>
    %5 = vector.extract_strided_slice %2 {offsets = [0, 128], sizes = [128, 128], strides = [1, 1]} : vector<128x256xf32> to vector<128x128xf32>
    %6 = math.exp %5 : vector<128x128xf32>
    %7 = arith.mulf %4, %6 : vector<128x128xf32>
    %c0_3 = arith.constant 0 : index
    %c0_4 = arith.constant 0 : index
    %8 = vector.load %arg3[%c0_3, %c0_4] : memref<128x128xf32, #tpu.memory_space<vmem>>, vector<128x128xf32>
    tpu.vector_store %arg3[%c0_3, %c0_4], %7 {strides = array<i32>} : memref<128x128xf32, #tpu.memory_space<vmem>>, vector<128x128xf32>,
    return
  }
  func.func @transform_0(%arg0: i32) -> (i32, i32) {
    %c0_i32 = arith.constant 0 : i32
    %c0_i32_0 = arith.constant 0 : i32
    return %c0_i32, %arg0 : i32, i32
  }
  func.func @transform_1(%arg0: i32) -> (i32, i32) {
    %c0_i32 = arith.constant 0 : i32
    %c0_i32_0 = arith.constant 0 : i32
    %c0_i32_1 = arith.constant 0 : i32
    return %c0_i32, %c0_i32_0 : i32, i32
  }
  func.func @transform_2(%arg0: i32) -> (i32, i32) {
    %c0_i32 = arith.constant 0 : i32
    %c0_i32_0 = arith.constant 0 : i32
    return %arg0, %c0_i32 : i32, i32
  }
}

</mosaic_0001>

<bundles_post_ra>
// kernel: gabor_injection_forward.1
= control target key start
LH: loop header
LB: loop body
LE: loop exit
PB: predicated region body
PF: predicated region fallthrough
CT: control target
= control target key end

     0   :  { %s2468_s9 = smov 0   ;;  %s3713_s0 = inlined_call_operand.vmem [shape: f32[8,256], index: 0, kind: input, shape index: {}]   ;;  %s3714_s1 = inlined_call_operand.vmem [shape: f32[8,256], index: 1, kind: input, shape index: {}]   ;;  %s3715_s2 = inlined_call_operand.vmem [shape: f32[256,128], index: 2, kind: output, shape index: {}]  }
   0x1 LB: > { %s2474_s10 = sadd.s32 4294967295, %s2444_s9   ;;  %p2175_p0 = scmp.ge.s32.totalorder %s2444_s9, 1  ;;  %s2444_s9 = sphi %s2468_s9, %s12_s9  }
   0x2   : > { %p111_p1 = scmp.lt.s32.totalorder %s2444_s9, 3 }
   0x4   : > { %p112_p2 = pnand %p2175_p0, %p111_p1 }
   0x5   : > { %p132_p3 = scmp.lt.s32.totalorder (!%p112_p2), %s2474_s10, 1  ;;  %s2177_s20 = sshll.u32 (!%p112_p2), %s2474_s10, 4 }
   0x6   : > { %115 = sbr.rel (%p112_p2) target bundleno = 781 (0x30d), region = 28  ;;  %p2701_p4 = scmp.lt.s32.totalorder (!%p112_p2), %s2177_s20, 31 }
   0xb   : > { %v144_v0 = vld [vmem:[%s3714_s1 + $0x8] sm:$0xff]  ;;  %v143_v1 = vld [vmem:[%s3714_s1] sm:$0xff]  ;;  %v2446_v2 = vmov 0.0   ;;  %s133_s15 = scalar_select %p132_p3, %s2474_s10, 1  ;;  %vm177_vm0 = vcmask 64512  }
   0xc   : > { %256 = vmatprep.subr.mxu0 %v144_v0  ;;  %290 = vmatprep.mubr.f32.mxu0 %v2446_v2  ;;  %v2447_v45 = vmov 683565275   ;;  %v2448_v47 = vmov 2475754826   ;;  %v2449_v50 = vmov 2131351028  }
   0xd   : > { %257 = vmatpush1.msra.mxu0 %v143_v1  ;;  %2261 = vmatprep.subr.mxu1 %v144_v0  ;;  %s2176_s16 = sshll.u32 %s133_s15, 3  ;;  %v2450_v52 = vmov 2102212464   ;;  %v2451_v54 = vmov 920167782   ;;  %s3746_s20 = smov (!%p2701_p4, %s2177_s20), 31 }
   0xe   : > { %2262 = vmatpush1.msra.mxu1 %v143_v1  ;;  %338 = vmatprep.mubr.f32.mxu1 %v2446_v2  ;;  %s135_s19 = scalar_lea.vmem %s3713_s0, %s2176_s16  ;;  %v2452_v61 = vmov 1326507024   ;;  %s2178_s22 = sshll.u32 %s3746_s20, 3 }
   0xf   : > { %v142_v3 = vld [vmem:[%s135_s19] sm:$0xff]  ;;  %s2752_s25 = scalar_lea.vmem %s3715_s2, %s2178_s22 }
  0x10   : > { %145 = vxpose.xlu0.b32.start.end [1/1] (short) %v142_v3, 128 }
  0x8c   : > { %v161_v4 = vpop.trf.xlu0 }
  0x8d   : > { %2179 = vmatmul.mubr.msk.f32.vlgmr.msra.gmra.mxu0 %vm177_vm0, %v161_v4 }
  0x8e   : > { %296 = vmatprep.mubr.f32.mxu0 %v2446_v2 }
  0x90   : > { %v162_v5 = vpop.trf.xlu0 }
  0x91   : > { %2180 = vmatmul.mubr.msk.f32.gmra.mxu0 %vm177_vm0, %v162_v5 }
  0x92   : > { %302 = vmatprep.mubr.f32.mxu0 %v2446_v2 }
  0x94   : > { %v163_v6 = vpop.trf.xlu0 }
  0x95   : > { %2181 = vmatmul.mubr.msk.f32.gmra.mxu0 %vm177_vm0, %v163_v6 }
  0x96   : > { %308 = vmatprep.mubr.f32.mxu0 %v2446_v2 }
  0x98   : > { %v164_v7 = vpop.trf.xlu0 }
  0x99   : > { %2182 = vmatmul.mubr.msk.f32.gmra.mxu0 %vm177_vm0, %v164_v7 }
  0x9a   : > { %314 = vmatprep.mubr.f32.mxu0 %v2446_v2 }
  0x9c   : > { %v165_v8 = vpop.trf.xlu0 }
  0x9d   : > { %2183 = vmatmul.mubr.msk.f32.gmra.mxu0 %vm177_vm0, %v165_v8 }
  0x9e   : > { %320 = vmatprep.mubr.f32.mxu0 %v2446_v2 }
  0xa0   : > { %v166_v9 = vpop.trf.xlu0 }
  0xa1   : > { %2184 = vmatmul.mubr.msk.f32.gmra.mxu0 %vm177_vm0, %v166_v9 }
  0xa2   : > { %326 = vmatprep.mubr.f32.mxu0 %v2446_v2 }
  0xa4   : > { %v167_v10 = vpop.trf.xlu0 }
  0xa5   : > { %2185 = vmatmul.mubr.msk.f32.gmra.mxu0 %vm177_vm0, %v167_v10 }
  0xa6   : > { %332 = vmatprep.mubr.f32.mxu0 %v2446_v2 }
  0xa8   : > { %v168_v11 = vpop.trf.xlu0 }
  0xa9   : > { %2186 = vmatmul.mubr.msk.f32.gmra.mxu0 %vm177_vm0, %v168_v11 }
  0xac   : > { %v169_v12 = vpop.trf.xlu0 }
  0xad   : > { %2187 = vmatmul.mubr.msk.f32.vlgmr.msra.gmra.mxu1 %vm177_vm0, %v169_v12 }
  0xae   : > { %344 = vmatprep.mubr.f32.mxu1 %v2446_v2 }
  0xb0   : > { %v170_v13 = vpop.trf.xlu0 }
  0xb1   : > { %2188 = vmatmul.mubr.msk.f32.gmra.mxu1 %vm177_vm0, %v170_v13 }
  0xb2   : > { %350 = vmatprep.mubr.f32.mxu1 %v2446_v2 }
  0xb4   : > { %v171_v14 = vpop.trf.xlu0 }
  0xb5   : > { %2189 = vmatmul.mubr.msk.f32.gmra.mxu1 %vm177_vm0, %v171_v14 }
  0xb6   : > { %356 = vmatprep.mubr.f32.mxu1 %v2446_v2 }
  0xb8   : > { %v172_v15 = vpop.trf.xlu0 }
  0xb9   : > { %2190 = vmatmul.mubr.msk.f32.gmra.mxu1 %vm177_vm0, %v172_v15 }
  0xba   : > { %362 = vmatprep.mubr.f32.mxu1 %v2446_v2 }
  0xbc   : > { %v173_v16 = vpop.trf.xlu0 }
  0xbd   : > { %2191 = vmatmul.mubr.msk.f32.gmra.mxu1 %vm177_vm0, %v173_v16 }
  0xbe   : > { %368 = vmatprep.mubr.f32.mxu1 %v2446_v2 }
  0xc0   : > { %v174_v17 = vpop.trf.xlu0 }
  0xc1   : > { %2192 = vmatmul.mubr.msk.f32.gmra.mxu1 %vm177_vm0, %v174_v17 }
  0xc2   : > { %374 = vmatprep.mubr.f32.mxu1 %v2446_v2 }
  0xc4   : > { %v175_v18 = vpop.trf.xlu0 }
  0xc5   : > { %2193 = vmatmul.mubr.msk.f32.gmra.mxu1 %vm177_vm0, %v175_v18 }
  0xc6   : > { %380 = vmatprep.mubr.f32.mxu1 %v2446_v2 }
  0xc8   : > { %v176_v19 = vpop.trf.xlu0 }
  0xc9   : > { %2194 = vmatmul.mubr.msk.f32.gmra.mxu1 %vm177_vm0, %v176_v19 }
 0x14d   : > { %v2505_v20 = vpop.f32.mrf.mxu0 }
 0x14e   : > { %v387_v21 = vand.u32 2147483647, %v2505_v20  ;;  %v390_v22 = vand.u32 2139095040, %v2505_v20  ;;  %vm389_vm14 = vcmp.lt.s32.totalorder %v2505_v20, 0 }
 0x14f   : > { %v2509_v23 = vpop.f32.mrf.mxu0 }
 0x150   : > { %v391_v24 = vshrl.u32 %v390_v22, 23  ;;  %v394_v25 = vand.u32 8388607, %v387_v21  ;;  %vm2610_vm15 = vcmp.le.f32.partialorder %v387_v21, 0.7853982 }
 0x151   : > { %v2513_v26 = vpop.f32.mrf.mxu0 }
 0x152   : > { %v2195_v27 = vadd.s32 4294967169, %v391_v24  ;;  %v491_v28 = vand.u32 2147483647, %v2513_v26  ;;  %v494_v29 = vand.u32 2139095040, %v2513_v26  ;;  %v395_v32 = vor.u32 8388608, %v394_v25 }
 0x153   : > { %v2517_v30 = vpop.f32.mrf.mxu0 }
 0x154   : > { %v397_v31 = vadd.s32 1, %v2195_v27  ;;  %v495_v33 = vshrl.u32 %v494_v29, 23  ;;  %v498_v34 = vand.u32 8388607, %v491_v28  ;;  %v2524_v41 = vshll.u32 %v395_v32, 8 }
 0x155   : > { %v2521_v35 = vpop.f32.mrf.mxu0 }
 0x156   : > { %vm398_vm1 = vcmp.gt.s32.totalorder %v397_v31, 0  ;;  %v2199_v37 = vadd.s32 4294967169, %v495_v33  ;;  %v598_v38 = vand.u32 2139095040, %v2521_v35  ;;  %v499_v42 = vor.u32 8388608, %v498_v34 }
 0x157   : > { %v399_v36 = vsel %vm398_vm1, %v397_v31, 0  ;;  %v595_v19 = vand.u32 2147483647, %v2521_v35 }
 0x158   : > { %v400_v39 = vshrl.u32 %v399_v36, 5  ;;  %v401_v40 = vand.u32 31, %v399_v36  ;;  %v501_v43 = vadd.s32 1, %v2199_v37  ;;  %v599_v49 = vshrl.u32 %v598_v38, 23 }
 0x159   : > { %v539_v32 = vshll.u32 %v499_v42, 8 }
 0x15a   : > { %v402_v44 = vsub.s32 32, %v401_v40  ;;  %v404_v46 = vshll.u32 %v2447_v45, %v401_v40  ;;  %v407_v48 = vshll.u32 %v2448_v47, %v401_v40  ;;  %v410_v51 = vshll.u32 %v2449_v50, %v401_v40 }
 0x15b   : > { %v413_v53 = vshll.u32 %v2450_v52, %v401_v40  ;;  %v416_v55 = vshll.u32 %v2451_v54, %v401_v40  ;;  %vm419_vm2 = vcmp.lt.s32.totalorder %v400_v39, 1  ;;  %vm420_vm3 = vcmp.lt.s32.totalorder %v400_v39, 2 }
 0x15c   : > { %v405_v56 = vshrl.u32 %v2448_v47, %v402_v44  ;;  %v408_v57 = vshrl.u32 %v2449_v50, %v402_v44  ;;  %v411_v58 = vshrl.u32 %v2450_v52, %v402_v44  ;;  %v403_v59 = vshrl.u32 %v2447_v45, %v402_v44 }
 0x15d   : > { %v414_v60 = vshrl.u32 %v2451_v54, %v402_v44  ;;  %v417_v62 = vshrl.u32 %v2452_v61, %v402_v44  ;;  %vm421_vm4 = vcmp.lt.s32.totalorder %v400_v39, 3  ;;  %vm502_vm5 = vcmp.gt.s32.totalorder %v501_v43, 0 }
 0x15e   : > { %v406_v63 = vor.u32 %v405_v56, %v404_v46  ;;  %v409_v0 = vor.u32 %v408_v57, %v407_v48  ;;  %v412_v1 = vor.u32 %v411_v58, %v410_v51  ;;  %vm422_vm6 = vcmp.lt.s32.totalorder %v400_v39, 4 }
 0x15f   : > { %v415_v2 = vor.u32 %v414_v60, %v413_v53  ;;  %v418_v3 = vor.u32 %v417_v62, %v416_v55  ;;  %v503_v4 = vsel %vm502_vm5, %v501_v43, 0  ;;  %v2203_v33 = vadd.s32 4294967169, %v599_v49 }
 0x160   : > { %v423_v5 = vsel %vm419_vm2, %v403_v59, %v406_v63  ;;  %v424_v6 = vsel %vm422_vm6, %v412_v1, 2102212464  ;;  %v427_v7 = vsel %vm419_vm2, %v406_v63, %v409_v0  ;;  %v431_v8 = vsel %vm419_vm2, %v409_v0, %v412_v1 }
 0x161   : > { %v425_v9 = vsel %vm421_vm4, %v409_v0, %v424_v6  ;;  %v428_v10 = vsel %vm422_vm6, %v415_v2, 920167782  ;;  %v432_v11 = vsel %vm422_vm6, %v418_v3, 1326507024  ;;  %v504_v12 = vshrl.u32 %v503_v4, 5 }
 0x162   : > { %v426_v13 = vsel %vm420_vm3, %v423_v5, %v425_v9  ;;  %v429_v14 = vsel %vm421_vm4, %v412_v1, %v428_v10  ;;  %v433_v15 = vsel %vm421_vm4, %v415_v2, %v432_v11  ;;  %v505_v16 = vand.u32 31, %v503_v4 }
 0x163   : > { %v430_v17 = vsel %vm420_vm3, %v427_v7, %v429_v14  ;;  %v434_v18 = vsel %vm420_vm3, %v431_v8, %v433_v15  ;;  %v442_v29 = vmul.u32 %v2524_v41, %v426_v13  ;;  %vm523_vm7 = vcmp.lt.s32.totalorder %v504_v12, 1 }
 0x164   : > { %v2548_v22 = vmul.u32.u64.low %v2524_v41, %v434_v18  ;;  %v2549_v24 = vmul.u32.u64.high %v2524_v41, %v434_v18, %v2548_v22  ;;  %v2552_v25 = vmul.u32.u64.low %v2524_v41, %v430_v17  ;;  %v2553_v27 = vmul.u32.u64.high %v2524_v41, %v430_v17, %v2552_v25 }
 0x165   : > { %v506_v31 = vsub.s32 32, %v505_v16  ;;  %v508_v34 = vshll.u32 %v2447_v45, %v505_v16  ;;  %v511_v36 = vshll.u32 %v2448_v47, %v505_v16  ;;  %v514_v37 = vshll.u32 %v2449_v50, %v505_v16 }
 0x166   : > { %v517_v43 = vshll.u32 %v2450_v52, %v505_v16  ;;  %vm444_vm8 = vc.u32 %v2549_v24, %v2552_v25  ;;  %v445_v41 = vadd.s32 1, %v2553_v27  ;;  %v520_v44 = vshll.u32 %v2451_v54, %v505_v16 }
 0x167   : > { %v509_v38 = vshrl.u32 %v2448_v47, %v506_v31  ;;  %v512_v39 = vshrl.u32 %v2449_v50, %v506_v31  ;;  %v515_v40 = vshrl.u32 %v2450_v52, %v506_v31  ;;  %v518_v42 = vshrl.u32 %v2451_v54, %v506_v31 }
 0x168   : > { %v521_v51 = vshrl.u32 %v2452_v61, %v506_v31  ;;  %v446_v53 = vsel %vm444_vm8, %v445_v41, %v2553_v27  ;;  %vm524_vm9 = vcmp.lt.s32.totalorder %v504_v12, 2  ;;  %vm526_vm10 = vcmp.lt.s32.totalorder %v504_v12, 4 }
 0x169   : > { %v510_v46 = vor.u32 %v509_v38, %v508_v34  ;;  %v513_v48 = vor.u32 %v512_v39, %v511_v36  ;;  %v516_v49 = vor.u32 %v515_v40, %v514_v37  ;;  %v519_v55 = vor.u32 %v518_v42, %v517_v43 }
 0x16a   : > { %v447_v56 = vadd.s32 %v446_v53, %v442_v29  ;;  %v507_v57 = vshrl.u32 %v2447_v45, %v506_v31  ;;  %v522_v58 = vor.u32 %v521_v51, %v520_v44  ;;  %vm525_vm11 = vcmp.lt.s32.totalorder %v504_v12, 3  ;;  %v2591_v12 = vpop.f32.mrf.mxu0 }
 0x16b   : > { %v528_v59 = vsel %vm526_vm10, %v516_v49, 2102212464  ;;  %v531_v60 = vsel %vm523_vm7, %v510_v46, %v513_v48  ;;  %v532_v62 = vsel %vm526_vm10, %v519_v55, 920167782  ;;  %v535_v63 = vsel %vm523_vm7, %v513_v48, %v516_v49 }
 0x16c   : > { %v448_v0 = vadd.s32 536870912, %v447_v56  ;;  %v527_v1 = vsel %vm523_vm7, %v507_v57, %v510_v46  ;;  %v533_v2 = vsel %vm525_vm11, %v516_v49, %v532_v62  ;;  %v536_v3 = vsel %vm526_vm10, %v522_v58, 1326507024 }
 0x16d   : > { %v529_v4 = vsel %vm525_vm11, %v513_v48, %v528_v59  ;;  %v534_v5 = vsel %vm524_vm9, %v531_v60, %v533_v2  ;;  %v537_v6 = vsel %vm525_vm11, %v519_v55, %v536_v3  ;;  %v605_v7 = vadd.s32 1, %v2203_v33 }
 0x16e   : > { %v449_v8 = vshrl.u32 %v448_v0, 30  ;;  %v538_v9 = vsel %vm524_vm9, %v535_v63, %v537_v6  ;;  %v2577_v10 = vmul.u32.u64.low %v539_v32, %v534_v5  ;;  %v2578_v11 = vmul.u32.u64.high %v539_v32, %v534_v5, %v2577_v10 }
 0x16f   : > { %v2581_v13 = vmul.u32.u64.low %v539_v32, %v538_v9  ;;  %v2582_v14 = vmul.u32.u64.high %v539_v32, %v538_v9, %v2581_v13  ;;  %vm606_vm12 = vcmp.gt.s32.totalorder %v605_v7, 0  ;;  %v530_v16 = vsel %vm524_vm9, %v527_v1, %v529_v4 }
 0x170   : > { %v450_v15 = vshll.u32 %v449_v8, 30  ;;  %v602_v17 = vand.u32 8388607, %v595_v19  ;;  %v607_v18 = vsel %vm606_vm12, %v605_v7, 0  ;;  %v549_v29 = vadd.s32 1, %v2578_v11 }
 0x171   : > { %v609_v22 = vand.u32 31, %v607_v18  ;;  %v546_v31 = vmul.u32 %v539_v32, %v530_v16  ;;  %vm548_vm13 = vc.u32 %v2582_v14, %v2577_v10  ;;  %v443_v40 = vadd.s32 %v2552_v25, %v2549_v24  ;;  %v2606_v24 = vpop.f32.mrf.mxu0 }
 0x172   : > { %v451_v27 = vsub.s32 %v447_v56, %v450_v15  ;;  %v550_v36 = vsel %vm548_vm13, %v549_v29, %v2578_v11  ;;  %v603_v37 = vor.u32 8388608, %v602_v17  ;;  %v473_v44 = vsub.s32 4, %v449_v8 }
 0x173   : > { %v610_v33 = vsub.s32 32, %v609_v22  ;;  %v551_v38 = vadd.s32 %v550_v36, %v546_v31  ;;  %v612_v46 = vshll.u32 %v2447_v45, %v609_v22  ;;  %v615_v51 = vshll.u32 %v2448_v47, %v609_v22 }
 0x174   : > { %v453_v34 = vsub.s32 0, %v451_v27  ;;  %v2599_v48 = vshll.u32 %v603_v37, 8  ;;  %v608_v57 = vshrl.u32 %v607_v18, 5  ;;  %v621_v58 = vshll.u32 %v2450_v52, %v609_v22 }
 0x175   : > { %v552_v43 = vadd.s32 536870912, %v551_v38  ;;  %v613_v32 = vshrl.u32 %v2448_v47, %v610_v33  ;;  %v616_v41 = vshrl.u32 %v2449_v50, %v610_v33  ;;  %v619_v53 = vshrl.u32 %v2450_v52, %v610_v33 }
 0x176   : > { %v2196_v39 = vmin.u32 %v453_v34, %v451_v27  ;;  %v622_v55 = vshrl.u32 %v2451_v54, %v610_v33  ;;  %v625_v59 = vshrl.u32 %v2452_v61, %v610_v33  ;;  %v618_v0 = vshll.u32 %v2449_v50, %v609_v22 }
 0x177   : > { %v2601_v49 = vshrl.u32 %v552_v43, 30  ;;  %v614_v62 = vor.u32 %v613_v32, %v612_v46  ;;  %v617_v63 = vor.u32 %v616_v41, %v615_v51  ;;  %v624_v2 = vshll.u32 %v2451_v54, %v609_v22 }
 0x178   : > { %v455_v42 = vclz %v2196_v39  ;;  %v623_v1 = vor.u32 %v622_v55, %v621_v58  ;;  %v699_v21 = vand.u32 2147483647, %v2606_v24  ;;  %v474_v4 = vsel %vm389_vm14, %v473_v44, %v449_v8 }
 0x179   : > { %v554_v60 = vshll.u32 %v2601_v49, 30  ;;  %v620_v6 = vor.u32 %v619_v53, %v618_v0  ;;  %v626_v11 = vor.u32 %v625_v59, %v624_v2  ;;  %vm627_vm1 = vcmp.lt.s32.totalorder %v608_v57, 1 }
 0x17a   : > { %v2197_v56 = vadd.s32 4294967294, %v455_v42  ;;  %vm629_vm2 = vcmp.lt.s32.totalorder %v608_v57, 3  ;;  %vm630_vm3 = vcmp.lt.s32.totalorder %v608_v57, 4  ;;  %v635_v15 = vsel %vm627_vm1, %v614_v62, %v617_v63 }
 0x17b   : > { %v2622_v5 = vsub.s32 %v551_v38, %v554_v60  ;;  %vm493_vm4 = vcmp.lt.s32.totalorder %v2513_v26, 0  ;;  %v636_v8 = vsel %vm630_vm3, %v623_v1, 920167782  ;;  %vm628_vm5 = vcmp.lt.s32.totalorder %v608_v57, 2 }
 0x17c   : > { %vm2198_vm0 = vcmp.lt.s32.totalorder %v2197_v56, 0  ;;  %v632_v29 = vsel %vm630_vm3, %v620_v6, 2102212464  ;;  %v637_v31 = vsel %vm629_vm2, %v620_v6, %v636_v8  ;;  %v611_v37 = vshrl.u32 %v2447_v45, %v610_v33 }
 0x17d   : > { %v458_v3 = vsel %vm2198_vm0, 0, %v2197_v56  ;;  %v557_v13 = vsub.s32 0, %v2622_v5  ;;  %v638_v38 = vsel %vm628_vm5, %v635_v15, %v637_v31  ;;  %vm2637_vm6 = vcmp.le.f32.partialorder %v491_v28, 0.7853982 }
 0x17e   : > { %v459_v7 = vsub.s32 32, %v458_v3  ;;  %v463_v9 = vsub.s32 4294967266, %v458_v3  ;;  %v460_v16 = vshll.u32 %v451_v27, %v458_v3  ;;  %v476_v27 = vsel %vm2610_vm15, 0, %v474_v4 }
 0x17f   : > { %v2200_v22 = vmin.u32 %v557_v13, %v2622_v5  ;;  %v577_v43 = vsub.s32 4, %v2601_v49  ;;  %v639_v32 = vsel %vm627_vm1, %v617_v63, %v620_v6  ;;  %v631_v42 = vsel %vm627_vm1, %v611_v37, %v614_v62 }
 0x180   : > { %v461_v17 = vshrl.u32 %v443_v40, %v459_v7  ;;  %v464_v18 = vadd.s32 127, %v463_v9  ;;  %v633_v33 = vsel %vm629_vm2, %v617_v63, %v632_v29  ;;  %v640_v44 = vsel %vm630_vm3, %v626_v11, 1326507024 }
 0x181   : > { %v559_v40 = vclz %v2200_v22  ;;  %v641_v51 = vsel %vm629_vm2, %v623_v1, %v640_v44  ;;  %v2648_v28 = vmul.u32.u64.low %v2599_v48, %v638_v38  ;;  %v2649_v53 = vmul.u32.u64.high %v2599_v48, %v638_v38, %v2648_v28 }
 0x182   : > { %v462_v34 = vor.u32 %v461_v17, %v460_v16  ;;  %v465_v36 = vshll.u32 %v464_v18, 23  ;;  %v642_v58 = vsel %vm628_vm5, %v639_v32, %v641_v51  ;;  %v702_v59 = vand.u32 2139095040, %v2606_v24 }
 0x183   : > { %v2201_v46 = vadd.s32 4294967294, %v559_v40  ;;  %v634_v60 = vsel %vm628_vm5, %v631_v42, %v633_v33  ;;  %v2656_v62 = vmul.u32.u64.low %v2599_v48, %v642_v58  ;;  %v2657_v63 = vmul.u32.u64.high %v2599_v48, %v642_v58, %v2656_v62 }
 0x184   : > { %v466_v41 = vor.u32 4788187, %v465_v36  ;;  %v469_v56 = vcvt.s32.f32 %v462_v34  ;;  %v547_v1 = vadd.s32 %v2577_v10, %v2582_v14  ;;  %v703_v3 = vshrl.u32 %v702_v59, 23  ;;  %v2678_v34 = vpop.f32.mrf.mxu0 }
 0x185   : > { %vm2202_vm7 = vcmp.lt.s32.totalorder %v2201_v46, 0  ;;  %v578_v7 = vsel %vm493_vm4, %v577_v43, %v2601_v49  ;;  %v653_v9 = vadd.s32 1, %v2649_v53  ;;  %v480_v11 = vadd.s32 3, %v476_v27 }
 0x186   : > { %v467_v55 = vand.u32 2147483647, %v466_v41  ;;  %v562_v2 = vsel %vm2202_vm7, 0, %v2201_v46  ;;  %v650_v13 = vmul.u32 %v2599_v48, %v634_v60  ;;  %v2207_v15 = vadd.s32 4294967169, %v703_v3  ;;  %v2687_v33 = vpop.f32.mrf.mxu0 }
 0x187   : > { %v563_v4 = vsub.s32 32, %v562_v2  ;;  %v567_v6 = vsub.s32 4294967266, %v562_v2  ;;  %v564_v16 = vshll.u32 %v2622_v5, %v562_v2  ;;  %vm652_vm8 = vc.u32 %v2657_v63, %v2648_v28 }
 0x188   : > { %v470_v0 = vmul.f32 %v469_v56, %v467_v55  ;;  %v580_v14 = vsel %vm2637_vm6, 0, %v578_v7  ;;  %v654_v49 = vsel %vm652_vm8, %v653_v9, %v2649_v53  ;;  %v709_v8 = vadd.s32 1, %v2207_v15 }
 0x189   : > { %v565_v17 = vshrl.u32 %v547_v1, %v563_v4  ;;  %v568_v18 = vadd.s32 127, %v567_v6  ;;  %v655_v29 = vadd.s32 %v654_v49, %v650_v13  ;;  %v2051_v31 = vmul.f32 1.442695, %v2509_v23 }
 0x18a   : > { %v471_v57 = vxor.u32 2147483648, %v470_v0  ;;  %vm710_vm9 = vcmp.gt.s32.totalorder %v709_v8, 0  ;;  %v2053_v37 = vmul.f32 1.442695, %v2517_v30  ;;  %v2681_v27 = vand.u32 3, %v480_v11 }
 0x18b   : > { %v566_v22 = vor.u32 %v565_v17, %v564_v16  ;;  %v569_v5 = vshll.u32 %v568_v18, 23  ;;  %v656_v38 = vadd.s32 536870912, %v655_v29  ;;  %v584_v40 = vadd.s32 3, %v580_v14 }
 0x18c   : > { %v472_v10 = vsel %vm389_vm14, %v471_v57, %v470_v0  ;;  %v706_v25 = vand.u32 8388607, %v699_v21  ;;  %v711_v43 = vsel %vm710_vm9, %v709_v8, 0  ;;  %vm486_vm10 = vcmp.eq.s32.totalorder %v2681_v27, 2 }
 0x18d   : > { %v475_v48 = vsel %vm2610_vm15, %v2505_v20, %v472_v10  ;;  %v570_v36 = vor.u32 4788187, %v569_v5  ;;  %v573_v41 = vcvt.s32.f32 %v566_v22  ;;  %v2685_v42 = vshrl.u32 %v656_v38, 30 }
 0x18e   : > { %2342 = vcosq.f32 %v475_v48  ;;  %v713_v23 = vand.u32 31, %v711_v43  ;;  %v2691_v51 = vand.u32 3, %v584_v40  ;;  %v707_v53 = vor.u32 8388608, %v706_v25 }
 0x18f   : > { %2344 = vsinq.f32 %v475_v48  ;;  %v571_v32 = vand.u32 2147483647, %v570_v36  ;;  %v658_v30 = vshll.u32 %v2685_v42, 30  ;;  %v806_v59 = vand.u32 2139095040, %v2687_v33 }
 0x190   : > { %2346 = vpow2.f32 %v2051_v31  ;;  %v714_v46 = vsub.s32 32, %v713_v23  ;;  %v716_v58 = vshll.u32 %v2447_v45, %v713_v23  ;;  %vm483_vm11 = vcmp.eq.s32.totalorder %v2681_v27, 0 }
 0x191   : > { %v574_v44 = vmul.f32 %v573_v41, %v571_v32  ;;  %2348 = vpow2.f32 %v2053_v37  ;;  %v2694_v56 = vsub.s32 %v655_v29, %v658_v30  ;;  %v719_v62 = vshll.u32 %v2448_v47, %v713_v23 }
 0x192   : > { %v717_v60 = vshrl.u32 %v2448_v47, %v714_v46  ;;  %v720_v0 = vshrl.u32 %v2449_v50, %v714_v46  ;;  %v723_v1 = vshrl.u32 %v2450_v52, %v714_v46  ;;  %vm482_vm12 = vcmp.lt.s32.totalorder %v2681_v27, 2 }
 0x193   : > { %v575_v55 = vxor.u32 2147483648, %v574_v44  ;;  %v661_v3 = vsub.s32 0, %v2694_v56  ;;  %v722_v4 = vshll.u32 %v2449_v50, %v713_v23  ;;  %v726_v6 = vshrl.u32 %v2451_v54, %v714_v46 }
 0x194   : > { %vm479_vm13 = vweird.f32 %v2505_v20  ;;  %v712_v9 = vshrl.u32 %v711_v43, 5  ;;  %v718_v57 = vor.u32 %v717_v60, %v716_v58  ;;  %v725_v11 = vshll.u32 %v2450_v52, %v713_v23 }
 0x195   : > { %v576_v2 = vsel %vm493_vm4, %v575_v55, %v574_v44  ;;  %v2204_v13 = vmin.u32 %v661_v3, %v2694_v56  ;;  %v721_v15 = vor.u32 %v720_v0, %v719_v62  ;;  %v724_v16 = vor.u32 %v723_v1, %v722_v4 }
 0x196   : > { %v579_v7 = vsel %vm2637_vm6, %v2513_v26, %v576_v2  ;;  %v727_v17 = vor.u32 %v726_v6, %v725_v11  ;;  %v728_v18 = vshll.u32 %v2451_v54, %v713_v23  ;;  %v729_v39 = vshrl.u32 %v2452_v61, %v714_v46 }
 0x197   : > { %2350 = vcosq.f32 %v579_v7  ;;  %v651_v14 = vadd.s32 %v2648_v28, %v2657_v63  ;;  %v663_v49 = vclz %v2204_v13  ;;  %v2731_v8 = vshll.u32 %v707_v53, 8 }
 0x198   : > { %2352 = vsinq.f32 %v579_v7  ;;  %v807_v48 = vshrl.u32 %v806_v59, 23  ;;  %v715_v29 = vshrl.u32 %v2447_v45, %v714_v46  ;;  %v730_v31 = vor.u32 %v729_v39, %v728_v18 }
 0x199   : > { %vm731_vm14 = vcmp.lt.s32.totalorder %v712_v9, 1  ;;  %v2205_v37 = vadd.s32 4294967294, %v663_v49  ;;  %vm733_vm15 = vcmp.lt.s32.totalorder %v712_v9, 3  ;;  %vm734_vm0 = vcmp.lt.s32.totalorder %v712_v9, 4 }
 0x19a   : > { %v736_v28 = vsel %vm734_vm0, %v724_v16, 2102212464  ;;  %v739_v63 = vsel %vm731_vm14, %v718_v57, %v721_v15  ;;  %v740_v40 = vsel %vm734_vm0, %v727_v17, 920167782  ;;  %vm732_vm2 = vcmp.lt.s32.totalorder %v712_v9, 2 }
 0x19b   : > { %v2343_v10 = vpop.eup %2342  ;;  %vm2206_vm1 = vcmp.lt.s32.totalorder %v2205_v37, 0  ;;  %v741_v43 = vsel %vm733_vm15, %v724_v16, %v740_v40  ;;  %v735_v44 = vsel %vm731_vm14, %v715_v29, %v718_v57  ;;  %v737_v30 = vsel %vm733_vm15, %v721_v15, %v736_v28 }
 0x19c   : > { %v2345_v22 = vpop.eup %2344  ;;  %v487_v5 = vxor.u32 2147483648, %v2343_v10  ;;  %v666_v23 = vsel %vm2206_vm1, 0, %v2205_v37  ;;  %v742_v27 = vsel %vm732_vm2, %v739_v63, %v741_v43  ;;  %vm597_vm3 = vcmp.lt.s32.totalorder %v2521_v35, 0 }
 0x19d   : > { %v484_v36 = vxor.u32 2147483648, %v2345_v22  ;;  %v2347_v32 = vpop.eup %2346  ;;  %v667_v55 = vsub.s32 32, %v666_v23  ;;  %v671_v58 = vsub.s32 4294967266, %v666_v23  ;;  %v668_v60 = vshll.u32 %v2694_v56, %v666_v23 }
 0x19e   : > { %v488_v38 = vsel %vm486_vm10, %v487_v5, %v2345_v22  ;;  %v2349_v46 = vpop.eup %2348  ;;  %v743_v62 = vsel %vm731_vm14, %v721_v15, %v724_v16  ;;  %v744_v20 = vsel %vm734_vm0, %v730_v31, 1326507024  ;;  %vm583_vm4 = vweird.f32 %v2513_v26 }
 0x19f   : > { %v485_v25 = vsel %vm483_vm11, %v2343_v10, %v484_v36  ;;  %v669_v0 = vshrl.u32 %v651_v14, %v667_v55  ;;  %v672_v1 = vadd.s32 127, %v671_v58  ;;  %v745_v2 = vsel %vm733_vm15, %v727_v17, %v744_v20 }
 0x1a0   : > { %v489_v41 = vsel %vm482_vm12, %v485_v25, %v488_v38  ;;  %v2211_v3 = vadd.s32 4294967169, %v807_v48  ;;  %v738_v4 = vsel %vm732_vm2, %v735_v44, %v737_v30  ;;  %v746_v6 = vsel %vm732_vm2, %v743_v62, %v745_v2  ;;  %v2778_v48 = vpop.f32.mrf.mxu0 }
 0x1a1   : > { %v490_v53 = vsel %vm479_vm13, nan, %v489_v41  ;;  %v2765_v7 = vmul.u32.u64.low %v2731_v8, %v742_v27  ;;  %v2766_v57 = vmul.u32.u64.high %v2731_v8, %v742_v27, %v2765_v7  ;;  %v670_v56 = vor.u32 %v669_v0, %v668_v60 }
 0x1a2   : > { %v2083_v59 = vmul.f32 %v2347_v32, %v490_v53  ;;  %v673_v11 = vshll.u32 %v672_v1, 23  ;;  %v2770_v13 = vmul.u32.u64.low %v2731_v8, %v746_v6  ;;  %v2771_v15 = vmul.u32.u64.high %v2731_v8, %v746_v6, %v2770_v13  ;;  %v2791_v43 = vpop.f32.mrf.mxu0 }
 0x1a3   : > { %vm587_vm5 = vcmp.eq.s32.totalorder %v2691_v51, 0  ;;  %vm590_vm6 = vcmp.eq.s32.totalorder %v2691_v51, 2  ;;  %v2055_v17 = vmul.f32 1.442695, %v2591_v12  ;;  %v813_v9 = vadd.s32 1, %v2211_v3 }
 0x1a4   : > { %2099 = vst [vmem:[%s2752_s25] sm:$0xff] %v2083_v59  ;;  %v2351_v16 = vpop.eup %2350  ;;  %v674_v10 = vor.u32 4788187, %v673_v11  ;;  %v681_v14 = vsub.s32 4, %v2685_v42  ;;  %v803_v49 = vand.u32 2147483647, %v2687_v33  ;;  %v754_v5 = vmul.u32 %v2731_v8, %v738_v4 }
 0x1a5   : > { %v2353_v18 = vpop.eup %2352  ;;  %v591_v39 = vxor.u32 2147483648, %v2351_v16  ;;  %v757_v29 = vadd.s32 1, %v2766_v57  ;;  %vm814_vm7 = vcmp.gt.s32.totalorder %v813_v9, 0  ;;  %v677_v37 = vcvt.s32.f32 %v670_v56 }
 0x1a6   : > { %v588_v22 = vxor.u32 2147483648, %v2353_v18  ;;  %v675_v36 = vand.u32 2147483647, %v674_v10  ;;  %vm756_vm8 = vc.u32 %v2771_v15, %v2765_v7  ;;  %vm586_vm9 = vcmp.lt.s32.totalorder %v2691_v51, 2 }
 0x1a7   : > { %v592_v31 = vsel %vm590_vm6, %v591_v39, %v2353_v18  ;;  %v758_v38 = vsel %vm756_vm8, %v757_v29, %v2766_v57  ;;  %v815_v28 = vsel %vm814_vm7, %v813_v9, 0  ;;  %v682_v8 = vsel %vm597_vm3, %v681_v14, %v2685_v42 }
 0x1a8   : > { %v589_v12 = vsel %vm587_vm5, %v2351_v16, %v588_v22  ;;  %v678_v40 = vmul.f32 %v677_v37, %v675_v36  ;;  %v759_v25 = vadd.s32 %v758_v38, %v754_v5  ;;  %vm2797_vm10 = vcmp.le.f32.partialorder %v595_v19, 0.7853982 }
 0x1a9   : > { %v593_v63 = vsel %vm586_vm9, %v589_v12, %v592_v31  ;;  %2354 = vpow2.f32 %v2055_v17  ;;  %v817_v41 = vand.u32 31, %v815_v28  ;;  %v810_v42 = vand.u32 8388607, %v803_v49 }
 0x1aa   : > { %v594_v32 = vsel %vm583_vm4, nan, %v593_v63  ;;  %v679_v44 = vxor.u32 2147483648, %v678_v40  ;;  %v760_v30 = vadd.s32 536870912, %v759_v25  ;;  %v684_v53 = vsel %vm2797_vm10, 0, %v682_v8 }
 0x1ab   : > { %v2084_v23 = vmul.f32 %v2349_v46, %v594_v32  ;;  %v816_v55 = vshrl.u32 %v815_v28, 5  ;;  %v818_v26 = vsub.s32 32, %v817_v41  ;;  %v910_v58 = vand.u32 2139095040, %v2791_v43 }
 0x1ac   : > { %v680_v19 = vsel %vm597_vm3, %v679_v44, %v678_v40  ;;  %v2809_v27 = vshrl.u32 %v760_v30, 30  ;;  %v820_v46 = vshll.u32 %v2447_v45, %v817_v41  ;;  %v823_v59 = vshll.u32 %v2448_v47, %v817_v41 }
 0x1ad   : > { %2100 = vst [vmem:[%s2752_s25 + $0x8] sm:$0xff] %v2084_v23  ;;  %v683_v60 = vsel %vm2797_vm10, %v2521_v35, %v680_v19  ;;  %v821_v62 = vshrl.u32 %v2448_v47, %v818_v26  ;;  %v824_v20 = vshrl.u32 %v2449_v50, %v818_v26  ;;  %v826_v0 = vshll.u32 %v2449_v50, %v817_v41 }
 0x1ae   : > { %2356 = vcosq.f32 %v683_v60  ;;  %v762_v1 = vshll.u32 %v2809_v27, 30  ;;  %v827_v2 = vshrl.u32 %v2450_v52, %v818_v26  ;;  %v829_v3 = vshll.u32 %v2450_v52, %v817_v41 }
 0x1af   : > { %2358 = vsinq.f32 %v683_v60  ;;  %v822_v4 = vor.u32 %v821_v62, %v820_v46  ;;  %v825_v6 = vor.u32 %v824_v20, %v823_v59  ;;  %v830_v57 = vshrl.u32 %v2451_v54, %v818_v26 }
 0x1b0   : > { %v2823_v56 = vsub.s32 %v759_v25, %v762_v1  ;;  %v828_v11 = vor.u32 %v827_v2, %v826_v0  ;;  %v832_v13 = vshll.u32 %v2451_v54, %v817_v41  ;;  %v833_v16 = vshrl.u32 %v2452_v61, %v818_v26 }
 0x1b1   : > { %v688_v17 = vadd.s32 3, %v684_v53  ;;  %v811_v9 = vor.u32 8388608, %v810_v42  ;;  %v831_v18 = vor.u32 %v830_v57, %v829_v3  ;;  %v911_v39 = vshrl.u32 %v910_v58, 23 }
 0x1b2   : > { %v765_v10 = vsub.s32 0, %v2823_v56  ;;  %v834_v14 = vor.u32 %v833_v16, %v832_v13  ;;  %vm835_vm11 = vcmp.lt.s32.totalorder %v816_v55, 1  ;;  %vm838_vm12 = vcmp.lt.s32.totalorder %v816_v55, 4 }
 0x1b3   : > { %vm837_vm13 = vcmp.lt.s32.totalorder %v816_v55, 3  ;;  %v840_v22 = vsel %vm838_vm12, %v828_v11, 2102212464  ;;  %v843_v5 = vsel %vm835_vm11, %v822_v4, %v825_v6  ;;  %v844_v29 = vsel %vm838_vm12, %v831_v18, 920167782 }
 0x1b4   : > { %v2208_v31 = vmin.u32 %v765_v10, %v2823_v56  ;;  %v819_v36 = vshrl.u32 %v2447_v45, %v818_v26  ;;  %vm836_vm14 = vcmp.lt.s32.totalorder %v816_v55, 2  ;;  %v845_v37 = vsel %vm837_vm13, %v828_v11, %v844_v29 }
 0x1b5   : > { %v846_v12 = vsel %vm836_vm14, %v843_v5, %v845_v37  ;;  %v847_v38 = vsel %vm835_vm11, %v825_v6, %v828_v11  ;;  %v848_v28 = vsel %vm838_vm12, %v834_v14, 1326507024  ;;  %v851_v63 = vshll.u32 %v811_v9, 8 }
 0x1b6   : > { %v2355_v40 = vpop.eup %2354  ;;  %v689_v8 = vand.u32 3, %v688_v17  ;;  %v767_v25 = vclz %v2208_v31  ;;  %v839_v32 = vsel %vm835_vm11, %v819_v36, %v822_v4  ;;  %v841_v51 = vsel %vm837_vm13, %v825_v6, %v840_v22 }
 0x1b7   : > { %v849_v41 = vsel %vm837_vm13, %v831_v18, %v848_v28  ;;  %v2837_v23 = vmul.u32.u64.low %v851_v63, %v846_v12  ;;  %v2838_v44 = vmul.u32.u64.high %v851_v63, %v846_v12, %v2837_v23  ;;  %vm687_vm15 = vweird.f32 %v2521_v35 }
 0x1b8   : > { %v2209_v30 = vadd.s32 4294967294, %v767_v25  ;;  %v850_v42 = vsel %vm836_vm14, %v847_v38, %v849_v41  ;;  %v2215_v53 = vadd.s32 4294967169, %v911_v39  ;;  %v2057_v26 = vmul.f32 1.442695, %v2678_v34  ;;  %v2872_v38 = vpop.f32.mrf.mxu0 }
 0x1b9   : > { %v842_v58 = vsel %vm836_vm14, %v839_v32, %v841_v51  ;;  %v2845_v19 = vmul.u32.u64.low %v851_v63, %v850_v42  ;;  %v2846_v46 = vmul.u32.u64.high %v851_v63, %v850_v42, %v2845_v19  ;;  %vm690_vm0 = vcmp.lt.s32.totalorder %v689_v8, 2 }
 0x1ba   : > { %vm691_vm1 = vcmp.eq.s32.totalorder %v689_v8, 0  ;;  %vm2210_vm2 = vcmp.lt.s32.totalorder %v2209_v30, 0  ;;  %v917_v59 = vadd.s32 1, %v2215_v53  ;;  %vm694_vm3 = vcmp.eq.s32.totalorder %v689_v8, 2  ;;  %v2890_v19 = vpop.f32.mrf.mxu0 }
 0x1bb   : > { %v2357_v60 = vpop.eup %2356  ;;  %v755_v62 = vadd.s32 %v2765_v7, %v2771_v15  ;;  %v770_v20 = vsel %vm2210_vm2, 0, %v2209_v30  ;;  %v861_v0 = vadd.s32 1, %v2838_v44  ;;  %v858_v3 = vmul.u32 %v851_v63, %v842_v58 }
 0x1bc   : > { %v2359_v1 = vpop.eup %2358  ;;  %v695_v2 = vxor.u32 2147483648, %v2357_v60  ;;  %v771_v34 = vsub.s32 32, %v770_v20  ;;  %v775_v55 = vsub.s32 4294967266, %v770_v20  ;;  %v772_v6 = vshll.u32 %v2823_v56, %v770_v20 }
 0x1bd   : > { %v692_v4 = vxor.u32 2147483648, %v2359_v1  ;;  %vm860_vm4 = vc.u32 %v2846_v46, %v2837_v23  ;;  %vm918_vm5 = vcmp.gt.s32.totalorder %v917_v59, 0  ;;  %v907_v17 = vand.u32 2147483647, %v2791_v43 }
 0x1be   : > { %v696_v57 = vsel %vm694_vm3, %v695_v2, %v2359_v1  ;;  %v773_v11 = vshrl.u32 %v755_v62, %v771_v34  ;;  %v776_v13 = vadd.s32 127, %v775_v55  ;;  %v862_v7 = vsel %vm860_vm4, %v861_v0, %v2838_v44 }
 0x1bf   : > { %v693_v15 = vsel %vm691_vm1, %v2357_v60, %v692_v4  ;;  %v863_v16 = vadd.s32 %v862_v7, %v858_v3  ;;  %v919_v9 = vsel %vm918_vm5, %v917_v59, 0  ;;  %v785_v10 = vsub.s32 4, %v2809_v27 }
 0x1c0   : > { %v697_v18 = vsel %vm690_vm0, %v693_v15, %v696_v57  ;;  %v774_v39 = vor.u32 %v773_v11, %v772_v6  ;;  %v777_v56 = vshll.u32 %v776_v13, 23  ;;  %v921_v5 = vand.u32 31, %v919_v9 }
 0x1c1   : > { %v698_v14 = vsel %vm687_vm15, nan, %v697_v18  ;;  %v864_v22 = vadd.s32 536870912, %v863_v16  ;;  %vm2863_vm6 = vcmp.le.f32.partialorder %v699_v21, 0.7853982  ;;  %vm701_vm7 = vcmp.lt.s32.totalorder %v2606_v24, 0 }
 0x1c2   : > { %v2085_v29 = vmul.f32 %v2355_v40, %v698_v14  ;;  %v778_v36 = vor.u32 4788187, %v777_v56  ;;  %2360 = vpow2.f32 %v2057_v26  ;;  %v914_v12 = vand.u32 8388607, %v907_v17 }
 0x1c3   : > { %v2868_v37 = vshrl.u32 %v864_v22, 30  ;;  %v922_v35 = vsub.s32 32, %v921_v5  ;;  %v781_v63 = vcvt.s32.f32 %v774_v39  ;;  %v786_v21 = vsel %vm701_vm7, %v785_v10, %v2809_v27 }
 0x1c4   : > { %2101 = vst [vmem:[%s2752_s25 + $0x10] sm:$0xff] %v2085_v29  ;;  %v779_v28 = vand.u32 2147483647, %v778_v36  ;;  %v920_v40 = vshrl.u32 %v919_v9, 5  ;;  %v924_v25 = vshll.u32 %v2447_v45, %v921_v5  ;;  %v927_v51 = vshll.u32 %v2448_v47, %v921_v5 }
 0x1c5   : > { %v866_v8 = vshll.u32 %v2868_v37, 30  ;;  %v925_v32 = vshrl.u32 %v2448_v47, %v922_v35  ;;  %v928_v44 = vshrl.u32 %v2449_v50, %v922_v35  ;;  %v931_v30 = vshrl.u32 %v2450_v52, %v922_v35 }
 0x1c6   : > { %v782_v41 = vmul.f32 %v781_v63, %v779_v28  ;;  %v934_v42 = vshrl.u32 %v2451_v54, %v922_v35  ;;  %v930_v27 = vshll.u32 %v2449_v50, %v921_v5  ;;  %v933_v26 = vshll.u32 %v2450_v52, %v921_v5 }
 0x1c7   : > { %v2885_v53 = vsub.s32 %v863_v16, %v866_v8  ;;  %v937_v58 = vshrl.u32 %v2452_v61, %v922_v35  ;;  %v788_v60 = vsel %vm2863_vm6, 0, %v786_v21  ;;  %v926_v62 = vor.u32 %v925_v32, %v924_v25 }
 0x1c8   : > { %v783_v59 = vxor.u32 2147483648, %v782_v41  ;;  %v929_v20 = vor.u32 %v928_v44, %v927_v51  ;;  %v932_v1 = vor.u32 %v931_v30, %v930_v27  ;;  %v935_v2 = vor.u32 %v934_v42, %v933_v26 }
 0x1c9   : > { %v869_v0 = vsub.s32 0, %v2885_v53  ;;  %v936_v34 = vshll.u32 %v2451_v54, %v921_v5  ;;  %v915_v3 = vor.u32 8388608, %v914_v12  ;;  %vm939_vm8 = vcmp.lt.s32.totalorder %v920_v40, 1 }
 0x1ca   : > { %v784_v55 = vsel %vm701_vm7, %v783_v59, %v782_v41  ;;  %v1014_v4 = vand.u32 2139095040, %v2890_v19  ;;  %vm942_vm9 = vcmp.lt.s32.totalorder %v920_v40, 4  ;;  %v923_v13 = vshrl.u32 %v2447_v45, %v922_v35 }
 0x1cb   : > { %v787_v6 = vsel %vm2863_vm6, %v2606_v24, %v784_v55  ;;  %v2212_v57 = vmin.u32 %v869_v0, %v2885_v53  ;;  %v938_v11 = vor.u32 %v937_v58, %v936_v34  ;;  %v947_v7 = vsel %vm939_vm8, %v926_v62, %v929_v20 }
 0x1cc   : > { %2362 = vcosq.f32 %v787_v6  ;;  %v948_v15 = vsel %vm942_vm9, %v935_v2, 920167782  ;;  %vm941_vm10 = vcmp.lt.s32.totalorder %v920_v40, 3  ;;  %v944_v9 = vsel %vm942_vm9, %v932_v1, 2102212464 }
 0x1cd   : > { %2364 = vsinq.f32 %v787_v6  ;;  %v871_v16 = vclz %v2212_v57  ;;  %vm940_vm11 = vcmp.lt.s32.totalorder %v920_v40, 2  ;;  %v949_v18 = vsel %vm941_vm10, %v932_v1, %v948_v15 }
 0x1ce   : > { %v951_v39 = vsel %vm939_vm8, %v929_v20, %v932_v1  ;;  %v955_v56 = vshll.u32 %v915_v3, 8  ;;  %v943_v14 = vsel %vm939_vm8, %v923_v13, %v926_v62  ;;  %v950_v22 = vsel %vm940_vm11, %v947_v7, %v949_v18 }
 0x1cf   : > { %v2213_v10 = vadd.s32 4294967294, %v871_v16  ;;  %v952_v5 = vsel %vm942_vm9, %v938_v11, 1326507024  ;;  %v2911_v29 = vpop.eup %2360  ;;  %v945_v31 = vsel %vm941_vm10, %v929_v20, %v944_v9  ;;  %v792_v28 = vadd.s32 3, %v788_v60  ;;  %v2945_v11 = vpop.f32.mrf.mxu0 }
 0x1d0   : > { %v953_v36 = vsel %vm941_vm10, %v935_v2, %v952_v5  ;;  %v2913_v12 = vmul.u32.u64.low %v955_v56, %v950_v22  ;;  %v2914_v35 = vmul.u32.u64.high %v955_v56, %v950_v22, %v2913_v12  ;;  %v1015_v21 = vshrl.u32 %v1014_v4, 23 }
 0x1d1   : > { %vm2214_vm12 = vcmp.lt.s32.totalorder %v2213_v10, 0  ;;  %v954_v63 = vsel %vm940_vm11, %v951_v39, %v953_v36  ;;  %v859_v8 = vadd.s32 %v2837_v23, %v2846_v46  ;;  %v946_v30 = vsel %vm940_vm11, %v943_v14, %v945_v31  ;;  %v2952_v31 = vpop.f32.mrf.mxu0 }
 0x1d2   : > { %v874_v25 = vsel %vm2214_vm12, 0, %v2213_v10  ;;  %v2920_v32 = vmul.u32.u64.low %v955_v56, %v954_v63  ;;  %v2921_v51 = vmul.u32.u64.high %v955_v56, %v954_v63, %v2920_v32  ;;  %v2219_v42 = vadd.s32 4294967169, %v1015_v21 }
 0x1d3   : > { %v875_v41 = vsub.s32 32, %v874_v25  ;;  %v879_v44 = vsub.s32 4294967266, %v874_v25  ;;  %v889_v27 = vsub.s32 4, %v2868_v37  ;;  %v2059_v26 = vmul.f32 1.442695, %v2778_v48 }
 0x1d4   : > { %v965_v58 = vadd.s32 1, %v2914_v35  ;;  %v1011_v59 = vand.u32 2147483647, %v2890_v19  ;;  %v876_v60 = vshll.u32 %v2885_v53, %v874_v25  ;;  %v1021_v62 = vadd.s32 1, %v2219_v42 }
 0x1d5   : > { %v877_v23 = vshrl.u32 %v859_v8, %v875_v41  ;;  %v880_v46 = vadd.s32 127, %v879_v44  ;;  %vm791_vm13 = vweird.f32 %v2606_v24  ;;  %v793_v20 = vand.u32 3, %v792_v28 }
 0x1d6   : > { %vm805_vm14 = vcmp.lt.s32.totalorder %v2687_v33, 0  ;;  %v962_v40 = vmul.u32 %v955_v56, %v946_v30  ;;  %vm964_vm15 = vc.u32 %v2921_v51, %v2913_v12  ;;  %vm1022_vm0 = vcmp.gt.s32.totalorder %v1021_v62, 0 }
 0x1d7   : > { %v878_v0 = vor.u32 %v877_v23, %v876_v60  ;;  %v881_v48 = vshll.u32 %v880_v46, 23  ;;  %v966_v1 = vsel %vm964_vm15, %v965_v58, %v2914_v35  ;;  %vm2936_vm1 = vcmp.le.f32.partialorder %v803_v49, 0.7853982 }
 0x1d8   : > { %2366 = vpow2.f32 %v2059_v26  ;;  %v967_v2 = vadd.s32 %v966_v1, %v962_v40  ;;  %v1023_v34 = vsel %vm1022_vm0, %v1021_v62, 0  ;;  %v890_v4 = vsel %vm805_vm14, %v889_v27, %v2868_v37 }
 0x1d9   : > { %v2363_v55 = vpop.eup %2362  ;;  %v882_v3 = vor.u32 4788187, %v881_v48  ;;  %v1018_v6 = vand.u32 8388607, %v1011_v59  ;;  %v1025_v57 = vand.u32 31, %v1023_v34  ;;  %vm794_vm2 = vcmp.lt.s32.totalorder %v793_v20, 2 }
 0x1da   : > { %v2365_v13 = vpop.eup %2364  ;;  %vm798_vm3 = vcmp.eq.s32.totalorder %v793_v20, 2  ;;  %v799_v49 = vxor.u32 2147483648, %v2363_v55  ;;  %v968_v7 = vadd.s32 536870912, %v967_v2  ;;  %v885_v9 = vcvt.s32.f32 %v878_v0 }
 0x1db   : > { %v796_v15 = vxor.u32 2147483648, %v2365_v13  ;;  %v883_v16 = vand.u32 2147483647, %v882_v3  ;;  %v1026_v18 = vsub.s32 32, %v1025_v57  ;;  %vm795_vm4 = vcmp.eq.s32.totalorder %v793_v20, 0 }
 0x1dc   : > { %v800_v39 = vsel %vm798_vm3, %v799_v49, %v2365_v13  ;;  %v892_v37 = vsel %vm2936_vm1, 0, %v890_v4  ;;  %v2949_v56 = vshrl.u32 %v968_v7, 30  ;;  %v1019_v22 = vor.u32 8388608, %v1018_v6 }
 0x1dd   : > { %v797_v10 = vsel %vm795_vm4, %v2363_v55, %v796_v15  ;;  %v886_v14 = vmul.f32 %v885_v9, %v883_v16  ;;  %v1029_v5 = vshrl.u32 %v2448_v47, %v1026_v18  ;;  %v1028_v28 = vshll.u32 %v2447_v45, %v1025_v57 }
 0x1de   : > { %v801_v36 = vsel %vm794_vm2, %v797_v10, %v800_v39  ;;  %v970_v35 = vshll.u32 %v2949_v56, 30  ;;  %v1032_v63 = vshrl.u32 %v2449_v50, %v1026_v18  ;;  %v1031_v25 = vshll.u32 %v2448_v47, %v1025_v57 }
 0x1df   : > { %v802_v21 = vsel %vm791_vm13, nan, %v801_v36  ;;  %v887_v8 = vxor.u32 2147483648, %v886_v14  ;;  %v1035_v32 = vshrl.u32 %v2450_v52, %v1026_v18  ;;  %v1024_v30 = vshrl.u32 %v1023_v34, 5 }
 0x1e0   : > { %v2086_v41 = vmul.f32 %v2911_v29, %v802_v21  ;;  %v2963_v44 = vsub.s32 %v967_v2, %v970_v35  ;;  %v1118_v42 = vand.u32 2139095040, %v2952_v31  ;;  %v1030_v26 = vor.u32 %v1029_v5, %v1028_v28 }
 0x1e1   : > { %v888_v27 = vsel %vm805_vm14, %v887_v8, %v886_v14  ;;  %v1033_v58 = vor.u32 %v1032_v63, %v1031_v25  ;;  %v1034_v24 = vshll.u32 %v2449_v50, %v1025_v57  ;;  %v1037_v29 = vshll.u32 %v2450_v52, %v1025_v57 }
 0x1e2   : > { %2102 = vst [vmem:[%s2752_s25 + $0x18] sm:$0xff] %v2086_v41  ;;  %v891_v60 = vsel %vm2936_vm1, %v2687_v33, %v888_v27  ;;  %v973_v23 = vsub.s32 0, %v2963_v44  ;;  %v1038_v46 = vshrl.u32 %v2451_v54, %v1026_v18  ;;  %v1040_v20 = vshll.u32 %v2451_v54, %v1025_v57 }
 0x1e3   : > { %2368 = vcosq.f32 %v891_v60  ;;  %v1036_v62 = vor.u32 %v1035_v32, %v1034_v24  ;;  %v1041_v40 = vshrl.u32 %v2452_v61, %v1026_v18  ;;  %v896_v0 = vadd.s32 3, %v892_v37 }
 0x1e4   : > { %2370 = vsinq.f32 %v891_v60  ;;  %v2216_v48 = vmin.u32 %v973_v23, %v2963_v44  ;;  %v1039_v1 = vor.u32 %v1038_v46, %v1037_v29  ;;  %v1027_v53 = vshrl.u32 %v2447_v45, %v1026_v18 }
 0x1e5   : > { %v2979_v2 = vpop.eup %2366  ;;  %v1042_v34 = vor.u32 %v1041_v40, %v1040_v20  ;;  %v1059_v55 = vshll.u32 %v1019_v22, 8  ;;  %v1119_v3 = vshrl.u32 %v1118_v42, 23  ;;  %vm1043_vm5 = vcmp.lt.s32.totalorder %v1024_v30, 1 }
 0x1e6   : > { %v975_v4 = vclz %v2216_v48  ;;  %vm1044_vm6 = vcmp.lt.s32.totalorder %v1024_v30, 2  ;;  %vm1046_vm7 = vcmp.lt.s32.totalorder %v1024_v30, 4  ;;  %vm1045_vm8 = vcmp.lt.s32.totalorder %v1024_v30, 3 }
 0x1e7   : > { %v1048_v6 = vsel %vm1046_vm7, %v1036_v62, 2102212464  ;;  %v1051_v57 = vsel %vm1043_vm5, %v1030_v26, %v1033_v58  ;;  %v1052_v13 = vsel %vm1046_vm7, %v1039_v1, 920167782  ;;  %v1047_v7 = vsel %vm1043_vm5, %v1027_v53, %v1030_v26 }
 0x1e8   : > { %v2217_v49 = vadd.s32 4294967294, %v975_v4  ;;  %v1053_v15 = vsel %vm1045_vm8, %v1036_v62, %v1052_v13  ;;  %v1055_v16 = vsel %vm1043_vm5, %v1033_v58, %v1036_v62  ;;  %v1049_v9 = vsel %vm1045_vm8, %v1033_v58, %v1048_v6 }
 0x1e9   : > { %v1054_v39 = vsel %vm1044_vm6, %v1051_v57, %v1053_v15  ;;  %v1056_v37 = vsel %vm1046_vm7, %v1042_v34, 1326507024  ;;  %v2223_v18 = vadd.s32 4294967169, %v1119_v3  ;;  %v897_v5 = vand.u32 3, %v896_v0 }
 0x1ea   : > { %vm2218_vm9 = vcmp.lt.s32.totalorder %v2217_v49, 0  ;;  %v1057_v10 = vsel %vm1045_vm8, %v1039_v1, %v1056_v37  ;;  %v2983_v14 = vmul.u32.u64.low %v1059_v55, %v1054_v39  ;;  %v2984_v22 = vmul.u32.u64.high %v1059_v55, %v1054_v39, %v2983_v14 }
 0x1eb   : > { %v963_v36 = vadd.s32 %v2913_v12, %v2921_v51  ;;  %v978_v35 = vsel %vm2218_vm9, 0, %v2217_v49  ;;  %v1058_v28 = vsel %vm1044_vm6, %v1055_v16, %v1057_v10  ;;  %v993_v8 = vsub.s32 4, %v2949_v56 }
 0x1ec   : > { %v979_v63 = vsub.s32 32, %v978_v35  ;;  %v983_v21 = vsub.s32 4294967266, %v978_v35  ;;  %v1125_v25 = vadd.s32 1, %v2223_v18  ;;  %vm895_vm10 = vweird.f32 %v2687_v33 }
 0x1ed   : > { %v980_v32 = vshll.u32 %v2963_v44, %v978_v35  ;;  %v1050_v41 = vsel %vm1044_vm6, %v1047_v7, %v1049_v9  ;;  %v2994_v42 = vmul.u32.u64.low %v1059_v55, %v1058_v28  ;;  %v2995_v27 = vmul.u32.u64.high %v1059_v55, %v1058_v28, %v2994_v42 }
 0x1ee   : > { %v981_v26 = vshrl.u32 %v963_v36, %v979_v63  ;;  %v984_v58 = vadd.s32 127, %v983_v21  ;;  %v1069_v12 = vadd.s32 1, %v2984_v22  ;;  %vm1126_vm11 = vcmp.gt.s32.totalorder %v1125_v25, 0 }
 0x1ef   : > { %vm898_vm12 = vcmp.lt.s32.totalorder %v897_v5, 2  ;;  %vm3000_vm13 = vcmp.le.f32.partialorder %v907_v17, 0.7853982  ;;  %vm909_vm14 = vcmp.lt.s32.totalorder %v2791_v43, 0  ;;  %v1127_v44 = vsel %vm1126_vm11, %v1125_v25, 0 }
 0x1f0   : > { %v2369_v30 = vpop.eup %2368  ;;  %v982_v24 = vor.u32 %v981_v26, %v980_v32  ;;  %v985_v60 = vshll.u32 %v984_v58, 23  ;;  %v1115_v23 = vand.u32 2147483647, %v2952_v31  ;;  %v1129_v29 = vand.u32 31, %v1127_v44 }
 0x1f1   : > { %v2371_v46 = vpop.eup %2370  ;;  %vm902_vm15 = vcmp.eq.s32.totalorder %v897_v5, 2  ;;  %v903_v62 = vxor.u32 2147483648, %v2369_v30  ;;  %v1066_v20 = vmul.u32 %v1059_v55, %v1050_v41  ;;  %vm1068_vm0 = vc.u32 %v2995_v27, %v2983_v14 }
 0x1f2   : > { %v900_v17 = vxor.u32 2147483648, %v2371_v46  ;;  %v986_v40 = vor.u32 4788187, %v985_v60  ;;  %v994_v0 = vsel %vm909_vm14, %v993_v8, %v2949_v56  ;;  %v1070_v48 = vsel %vm1068_vm0, %v1069_v12, %v2984_v22 }
 0x1f3   : > { %vm899_vm1 = vcmp.eq.s32.totalorder %v897_v5, 0  ;;  %v904_v1 = vsel %vm902_vm15, %v903_v62, %v2371_v46  ;;  %v1071_v53 = vadd.s32 %v1070_v48, %v1066_v20  ;;  %v1130_v34 = vsub.s32 32, %v1129_v29  ;;  %v3059_v48 = vpop.f32.mrf.mxu1 }
 0x1f4   : > { %v901_v3 = vsel %vm899_vm1, %v2369_v30, %v900_v17  ;;  %v987_v4 = vand.u32 2147483647, %v986_v40  ;;  %v989_v6 = vcvt.s32.f32 %v982_v24  ;;  %v1122_v55 = vand.u32 8388607, %v1115_v23 }
 0x1f5   : > { %v905_v57 = vsel %vm898_vm12, %v901_v3, %v904_v1  ;;  %v996_v13 = vsel %vm3000_vm13, 0, %v994_v0  ;;  %v1072_v49 = vadd.s32 536870912, %v1071_v53  ;;  %v1133_v56 = vshrl.u32 %v2448_v47, %v1130_v34 }
 0x1f6   : > { %v906_v7 = vsel %vm895_vm10, nan, %v905_v57  ;;  %v990_v15 = vmul.f32 %v989_v6, %v987_v4  ;;  %v3020_v16 = vshrl.u32 %v1127_v44, 5  ;;  %v1136_v9 = vshrl.u32 %v2449_v50, %v1130_v34 }
 0x1f7   : > { %v2087_v39 = vmul.f32 %v2979_v2, %v906_v7  ;;  %v3024_v37 = vshrl.u32 %v1072_v49, 30  ;;  %v1132_v18 = vshll.u32 %v2447_v45, %v1129_v29  ;;  %v1139_v10 = vshrl.u32 %v2450_v52, %v1130_v34 }
 0x1f8   : > { %v991_v22 = vxor.u32 2147483648, %v990_v15  ;;  %v1135_v5 = vshll.u32 %v2448_v47, %v1129_v29  ;;  %v1141_v36 = vshll.u32 %v2450_v52, %v1129_v29  ;;  %v1142_v33 = vshrl.u32 %v2451_v54, %v1130_v34 }
 0x1f9   : > { %2103 = vst [vmem:[%s2752_s25 + $0x20] sm:$0xff] %v2087_v39  ;;  %v1074_v35 = vshll.u32 %v3024_v37, 30  ;;  %v1134_v28 = vor.u32 %v1133_v56, %v1132_v18  ;;  %v1138_v63 = vshll.u32 %v2449_v50, %v1129_v29  ;;  %v1145_v2 = vshrl.u32 %v2452_v61, %v1130_v34 }
 0x1fa   : > { %v992_v21 = vsel %vm909_vm14, %v991_v22, %v990_v15  ;;  %v1137_v8 = vor.u32 %v1136_v9, %v1135_v5  ;;  %v1143_v25 = vor.u32 %v1142_v33, %v1141_v36  ;;  %v1144_v32 = vshll.u32 %v2451_v54, %v1129_v29 }
 0x1fb   : > { %v995_v41 = vsel %vm3000_vm13, %v2791_v43, %v992_v21  ;;  %v2061_v42 = vmul.f32 1.442695, %v2872_v38  ;;  %v3042_v26 = vsub.s32 %v1071_v53, %v1074_v35  ;;  %v1140_v58 = vor.u32 %v1139_v10, %v1138_v63  ;;  %v3087_v10 = vpop.f32.mrf.mxu1 }
 0x1fc   : > { %2372 = vcosq.f32 %v995_v41  ;;  %v1000_v12 = vadd.s32 3, %v996_v13  ;;  %v1123_v44 = vor.u32 8388608, %v1122_v55  ;;  %v1146_v30 = vor.u32 %v1145_v2, %v1144_v32 }
 0x1fd   : > { %2374 = vsinq.f32 %v995_v41  ;;  %v1077_v24 = vsub.s32 0, %v3042_v26  ;;  %vm1147_vm2 = vcmp.lt.s32.totalorder %v3020_v16, 1  ;;  %vm1150_vm3 = vcmp.lt.s32.totalorder %v3020_v16, 4  ;;  %v3099_v41 = vpop.f32.mrf.mxu1 }
 0x1fe   : > { %v1131_v60 = vshrl.u32 %v2447_v45, %v1130_v34  ;;  %vm1149_vm4 = vcmp.lt.s32.totalorder %v3020_v16, 3  ;;  %v1155_v38 = vsel %vm1147_vm2, %v1134_v28, %v1137_v8  ;;  %v1156_v51 = vsel %vm1150_vm3, %v1143_v25, 920167782 }
 0x1ff   : > { %v2220_v29 = vmin.u32 %v1077_v24, %v3042_v26  ;;  %vm1148_vm5 = vcmp.lt.s32.totalorder %v3020_v16, 2  ;;  %v1152_v46 = vsel %vm1150_vm3, %v1140_v58, 2102212464  ;;  %v1157_v62 = vsel %vm1149_vm4, %v1140_v58, %v1156_v51 }
 0x200   : > { %v1158_v20 = vsel %vm1148_vm5, %v1155_v38, %v1157_v62  ;;  %v1159_v17 = vsel %vm1147_vm2, %v1137_v8, %v1140_v58  ;;  %v1160_v40 = vsel %vm1150_vm3, %v1146_v30, 1326507024  ;;  %v1163_v0 = vshll.u32 %v1123_v44, 8 }
 0x201   : > { %v1001_v1 = vand.u32 3, %v1000_v12  ;;  %2376 = vpow2.f32 %v2061_v42  ;;  %v1079_v53 = vclz %v2220_v29  ;;  %v1151_v34 = vsel %vm1147_vm2, %v1131_v60, %v1134_v28 }
 0x202   : > { %v1153_v3 = vsel %vm1149_vm4, %v1137_v8, %v1152_v46  ;;  %v1161_v4 = vsel %vm1149_vm4, %v1143_v25, %v1160_v40  ;;  %v3067_v6 = vmul.u32.u64.low %v1163_v0, %v1158_v20  ;;  %v3068_v55 = vmul.u32.u64.high %v1163_v0, %v1158_v20, %v3067_v6  ;;  %v336_v40 = vpop.f32.mrf.mxu0 }
 0x203   : > { %vm1013_vm6 = vcmp.lt.s32.totalorder %v2890_v19, 0  ;;  %v2221_v57 = vadd.s32 4294967294, %v1079_v53  ;;  %v1162_v13 = vsel %vm1148_vm5, %v1159_v17, %v1161_v4  ;;  %v1222_v49 = vand.u32 2139095040, %v3059_v48 }
 0x204   : > { %vm3077_vm7 = vcmp.le.f32.partialorder %v1011_v59, 0.7853982  ;;  %v2063_v7 = vmul.f32 1.442695, %v2945_v11  ;;  %v3082_v15 = vmul.u32.u64.low %v1163_v0, %v1162_v13  ;;  %v3083_v9 = vmul.u32.u64.high %v1163_v0, %v1162_v13, %v3082_v15 }
 0x205   : > { %vm1003_vm8 = vcmp.eq.s32.totalorder %v1001_v1, 0  ;;  %vm2222_vm9 = vcmp.lt.s32.totalorder %v2221_v57, 0  ;;  %v1154_v39 = vsel %vm1148_vm5, %v1151_v34, %v1153_v3  ;;  %v1223_v18 = vshrl.u32 %v1222_v49, 23 }
 0x206   : > { %vm999_vm10 = vweird.f32 %v2791_v43  ;;  %v1082_v22 = vsel %vm2222_vm9, 0, %v2221_v57  ;;  %v1097_v59 = vsub.s32 4, %v3024_v37  ;;  %v1173_v5 = vadd.s32 1, %v3068_v55 }
 0x207   : > { %v1219_v11 = vand.u32 2147483647, %v3059_v48  ;;  %v1067_v36 = vadd.s32 %v2983_v14, %v2995_v27  ;;  %v1083_v33 = vsub.s32 32, %v1082_v22  ;;  %v1087_v35 = vsub.s32 4294967266, %v1082_v22 }
 0x208   : > { %v2227_v28 = vadd.s32 4294967169, %v1223_v18  ;;  %vm1006_vm11 = vcmp.eq.s32.totalorder %v1001_v1, 2  ;;  %v1084_v16 = vshll.u32 %v3042_v26, %v1082_v22  ;;  %v1170_v63 = vmul.u32 %v1163_v0, %v1154_v39 }
 0x209   : > { %vm1172_vm12 = vc.u32 %v3083_v9, %v3067_v6  ;;  %v2373_v2 = vpop.eup %2372  ;;  %v1085_v21 = vshrl.u32 %v1067_v36, %v1083_v33  ;;  %v1088_v8 = vadd.s32 127, %v1087_v35  ;;  %v1098_v27 = vsel %vm1013_vm6, %v1097_v59, %v3024_v37 }
 0x20a   : > { %v1174_v25 = vsel %vm1172_vm12, %v1173_v5, %v3068_v55  ;;  %v1229_v32 = vadd.s32 1, %v2227_v28  ;;  %v2375_v42 = vpop.eup %2374  ;;  %v1007_v14 = vxor.u32 2147483648, %v2373_v2  ;;  %v1226_v26 = vand.u32 8388607, %v1219_v11 }
 0x20b   : > { %v1175_v58 = vadd.s32 %v1174_v25, %v1170_v63  ;;  %v1004_v12 = vxor.u32 2147483648, %v2375_v42  ;;  %v1086_v44 = vor.u32 %v1085_v21, %v1084_v16  ;;  %v1089_v30 = vshll.u32 %v1088_v8, 23 }
 0x20c   : > { %vm1230_vm13 = vcmp.gt.s32.totalorder %v1229_v32, 0  ;;  %v1008_v24 = vsel %vm1006_vm11, %v1007_v14, %v2375_v42  ;;  %v1326_v51 = vand.u32 2139095040, %v3099_v41  ;;  %vm1002_vm14 = vcmp.lt.s32.totalorder %v1001_v1, 2 }
 0x20d   : > { %v1176_v60 = vadd.s32 536870912, %v1175_v58  ;;  %v1231_v38 = vsel %vm1230_vm13, %v1229_v32, 0  ;;  %v1005_v29 = vsel %vm1003_vm8, %v2373_v2, %v1004_v12  ;;  %v1090_v46 = vor.u32 4788187, %v1089_v30 }
 0x20e   : > { %v1100_v37 = vsel %vm3077_vm7, 0, %v1098_v27  ;;  %v2377_v62 = vpop.eup %2376  ;;  %v1009_v20 = vsel %vm1002_vm14, %v1005_v29, %v1008_v24  ;;  %v1227_v0 = vor.u32 8388608, %v1226_v26  ;;  %v1233_v53 = vand.u32 31, %v1231_v38 }
 0x20f   : > { %v3111_v17 = vshrl.u32 %v1176_v60, 30  ;;  %v1010_v34 = vsel %vm999_vm10, nan, %v1009_v20  ;;  %v1091_v3 = vand.u32 2147483647, %v1090_v46  ;;  %v1093_v4 = vcvt.s32.f32 %v1086_v44 }
 0x210   : > { %v2088_v55 = vmul.f32 %v2377_v62, %v1010_v34  ;;  %v1234_v57 = vsub.s32 32, %v1233_v53  ;;  %v1327_v13 = vshrl.u32 %v1326_v51, 23  ;;  %v1104_v15 = vadd.s32 3, %v1100_v37 }
 0x211   : > { %v1178_v1 = vshll.u32 %v3111_v17, 30  ;;  %v1094_v49 = vmul.f32 %v1093_v4, %v1091_v3  ;;  %2378 = vpow2.f32 %v2063_v7  ;;  %v3116_v39 = vmul.f32 1.442695, %v336_v40 }
 0x212   : > { %2104 = vst [vmem:[%s2752_s25 + $0x28] sm:$0xff] %v2088_v55  ;;  %v1232_v22 = vshrl.u32 %v1231_v38, 5  ;;  %v1237_v59 = vshrl.u32 %v2448_v47, %v1234_v57  ;;  %v3122_v43 = vshll.u32 %v1227_v0, 8  ;;  %v1236_v36 = vshll.u32 %v2447_v45, %v1233_v53 }
 0x213   : > { %v3119_v18 = vsub.s32 %v1175_v58, %v1178_v1  ;;  %v1095_v5 = vxor.u32 2147483648, %v1094_v49  ;;  %v1240_v33 = vshrl.u32 %v2449_v50, %v1234_v57  ;;  %v1243_v35 = vshrl.u32 %v2450_v52, %v1234_v57 }
 0x214   : > { %v1239_v7 = vshll.u32 %v2448_v47, %v1233_v53  ;;  %v1242_v16 = vshll.u32 %v2449_v50, %v1233_v53  ;;  %v2231_v63 = vadd.s32 4294967169, %v1327_v13  ;;  %v1238_v21 = vor.u32 %v1237_v59, %v1236_v36 }
 0x215   : > { %v1181_v28 = vsub.s32 0, %v3119_v18  ;;  %v1096_v2 = vsel %vm1013_vm6, %v1095_v5, %v1094_v49  ;;  %v1245_v8 = vshll.u32 %v2450_v52, %v1233_v53  ;;  %v1246_v25 = vshrl.u32 %v2451_v54, %v1234_v57 }
 0x216   : > { %v1099_v32 = vsel %vm3077_vm7, %v2890_v19, %v1096_v2  ;;  %v1241_v14 = vor.u32 %v1240_v33, %v1239_v7  ;;  %v1244_v27 = vor.u32 %v1243_v35, %v1242_v16  ;;  %v1248_v26 = vshll.u32 %v2451_v54, %v1233_v53 }
 0x217   : > { %v2224_v42 = vmin.u32 %v1181_v28, %v3119_v18  ;;  %2380 = vcosq.f32 %v1099_v32  ;;  %v1247_v58 = vor.u32 %v1246_v25, %v1245_v8  ;;  %v1249_v12 = vshrl.u32 %v2452_v61, %v1234_v57 }
 0x218   : > { %2382 = vsinq.f32 %v1099_v32  ;;  %vm1251_vm15 = vcmp.lt.s32.totalorder %v1232_v22, 1  ;;  %vm1252_vm0 = vcmp.lt.s32.totalorder %v1232_v22, 2  ;;  %v1235_v30 = vshrl.u32 %v2447_v45, %v1234_v57 }
 0x219   : > { %v1183_v44 = vclz %v2224_v42  ;;  %v1250_v24 = vor.u32 %v1249_v12, %v1248_v26  ;;  %vm1253_vm1 = vcmp.lt.s32.totalorder %v1232_v22, 3  ;;  %vm1254_vm2 = vcmp.lt.s32.totalorder %v1232_v22, 4 }
 0x21a   : > { %vm1117_vm3 = vcmp.lt.s32.totalorder %v2952_v31, 0  ;;  %v1256_v60 = vsel %vm1254_vm2, %v1244_v27, 2102212464  ;;  %v1259_v38 = vsel %vm1251_vm15, %v1238_v21, %v1241_v14  ;;  %v1260_v51 = vsel %vm1254_vm2, %v1247_v58, 920167782 }
 0x21b   : > { %v2225_v56 = vadd.s32 4294967294, %v1183_v44  ;;  %v1255_v29 = vsel %vm1251_vm15, %v1235_v30, %v1238_v21  ;;  %v1261_v46 = vsel %vm1253_vm1, %v1244_v27, %v1260_v51  ;;  %v1263_v37 = vsel %vm1251_vm15, %v1241_v14, %v1244_v27 }
 0x21c   : > { %v1264_v62 = vsel %vm1254_vm2, %v1250_v24, 1326507024  ;;  %v1257_v20 = vsel %vm1253_vm1, %v1241_v14, %v1256_v60  ;;  %v1262_v40 = vsel %vm1252_vm0, %v1259_v38, %v1261_v46  ;;  %vm3145_vm5 = vcmp.le.f32.partialorder %v1115_v23, 0.7853982 }
 0x21d   : > { %vm2226_vm4 = vcmp.lt.s32.totalorder %v2225_v56, 0  ;;  %v1265_v0 = vsel %vm1253_vm1, %v1247_v58, %v1264_v62  ;;  %v3151_v4 = vmul.u32.u64.low %v3122_v43, %v1262_v40  ;;  %v3152_v55 = vmul.u32.u64.high %v3122_v43, %v1262_v40, %v3151_v4 }
 0x21e   : > { %v1186_v34 = vsel %vm2226_vm4, 0, %v2225_v56  ;;  %v1266_v3 = vsel %vm1252_vm0, %v1263_v37, %v1265_v0  ;;  %v2379_v1 = vpop.eup %2378  ;;  %v1105_v57 = vand.u32 3, %v1104_v15  ;;  %v1171_v13 = vadd.s32 %v3067_v6, %v3083_v9 }
 0x21f   : > { %v1187_v49 = vsub.s32 32, %v1186_v34  ;;  %v1191_v59 = vsub.s32 4294967266, %v1186_v34  ;;  %v1201_v23 = vsub.s32 4, %v3111_v17  ;;  %v1333_v33 = vadd.s32 1, %v2231_v63 }
 0x220   : > { %v3159_v5 = vmul.u32.u64.low %v3122_v43, %v1266_v3  ;;  %v3160_v36 = vmul.u32.u64.high %v3122_v43, %v1266_v3, %v3159_v5  ;;  %v1188_v35 = vshll.u32 %v3119_v18, %v1186_v34  ;;  %v1258_v16 = vsel %vm1252_vm0, %v1255_v29, %v1257_v20 }
 0x221   : > { %v1189_v28 = vshrl.u32 %v1171_v13, %v1187_v49  ;;  %v1192_v7 = vadd.s32 127, %v1191_v59  ;;  %vm1103_vm6 = vweird.f32 %v2890_v19  ;;  %2384 = vpow2.f32 %v3116_v39 }
 0x222   : > { %v1277_v6 = vadd.s32 1, %v3152_v55  ;;  %v1323_v9 = vand.u32 2147483647, %v3099_v41  ;;  %vm1334_vm7 = vcmp.gt.s32.totalorder %v1333_v33, 0  ;;  %vm1106_vm8 = vcmp.lt.s32.totalorder %v1105_v57, 2 }
 0x223   : > { %v1190_v15 = vor.u32 %v1189_v28, %v1188_v35  ;;  %v1193_v2 = vshll.u32 %v1192_v7, 23  ;;  %v1335_v21 = vsel %vm1334_vm7, %v1333_v33, 0  ;;  %v1202_v18 = vsel %vm1117_vm3, %v1201_v23, %v3111_v17  ;;  %v3206_v7 = vpop.f32.mrf.mxu1 }
 0x224   : > { %v1274_v22 = vmul.u32 %v3122_v43, %v1258_v16  ;;  %vm1276_vm9 = vc.u32 %v3160_v36, %v3151_v4  ;;  %v1337_v63 = vand.u32 31, %v1335_v21  ;;  %v2381_v39 = vpop.eup %2380  ;;  %vm1107_vm10 = vcmp.eq.s32.totalorder %v1105_v57, 0 }
 0x225   : > { %vm1110_vm11 = vcmp.eq.s32.totalorder %v1105_v57, 2  ;;  %v1194_v8 = vor.u32 4788187, %v1193_v2  ;;  %v1278_v25 = vsel %vm1276_vm9, %v1277_v6, %v3152_v55  ;;  %v2383_v32 = vpop.eup %2382  ;;  %v1111_v42 = vxor.u32 2147483648, %v2381_v39 }
 0x226   : > { %v1279_v14 = vadd.s32 %v1278_v25, %v1274_v22  ;;  %v1330_v27 = vand.u32 8388607, %v1323_v9  ;;  %v1338_v58 = vsub.s32 32, %v1337_v63  ;;  %v1108_v17 = vxor.u32 2147483648, %v2383_v32 }
 0x227   : > { %v1195_v26 = vand.u32 2147483647, %v1194_v8  ;;  %v1197_v43 = vcvt.s32.f32 %v1190_v15  ;;  %v1204_v12 = vsel %vm3145_vm5, 0, %v1202_v18  ;;  %v1112_v44 = vsel %vm1110_vm11, %v1111_v42, %v2383_v32  ;;  %v3216_v8 = vpop.f32.mrf.mxu1 }
 0x228   : > { %v1280_v30 = vadd.s32 536870912, %v1279_v14  ;;  %v3179_v24 = vshrl.u32 %v1335_v21, 5  ;;  %v1341_v56 = vshrl.u32 %v2448_v47, %v1338_v58  ;;  %v1109_v60 = vsel %vm1107_vm10, %v2381_v39, %v1108_v17 }
 0x229   : > { %v1198_v38 = vmul.f32 %v1197_v43, %v1195_v26  ;;  %v1340_v51 = vshll.u32 %v2447_v45, %v1337_v63  ;;  %v1344_v29 = vshrl.u32 %v2449_v50, %v1338_v58  ;;  %v1113_v46 = vsel %vm1106_vm8, %v1109_v60, %v1112_v44 }
 0x22a   : > { %v3186_v37 = vshrl.u32 %v1280_v30, 30  ;;  %v1343_v62 = vshll.u32 %v2448_v47, %v1337_v63  ;;  %v1347_v20 = vshrl.u32 %v2450_v52, %v1338_v58  ;;  %v1114_v40 = vsel %vm1103_vm6, nan, %v1113_v46 }
 0x22b   : > { %v1199_v0 = vxor.u32 2147483648, %v1198_v38  ;;  %v1342_v34 = vor.u32 %v1341_v56, %v1340_v51  ;;  %v1346_v3 = vshll.u32 %v2449_v50, %v1337_v63  ;;  %v2089_v55 = vmul.f32 %v2379_v1, %v1114_v40 }
 0x22c   : > { %v1282_v13 = vshll.u32 %v3186_v37, 30  ;;  %v1349_v57 = vshll.u32 %v2450_v52, %v1337_v63  ;;  %v1350_v49 = vshrl.u32 %v2451_v54, %v1338_v58  ;;  %v1345_v23 = vor.u32 %v1344_v29, %v1343_v62 }
 0x22d   : > { %v1200_v59 = vsel %vm1117_vm3, %v1199_v0, %v1198_v38  ;;  %v1352_v5 = vshll.u32 %v2451_v54, %v1337_v63  ;;  %v1353_v19 = vshrl.u32 %v2452_v61, %v1338_v58  ;;  %2105 = vst [vmem:[%s2752_s25 + $0x30] sm:$0xff] %v2089_v55  ;;  %v1348_v35 = vor.u32 %v1347_v20, %v1346_v3 }
 0x22e   : > { %v1203_v33 = vsel %vm3145_vm5, %v2952_v31, %v1200_v59  ;;  %v3204_v1 = vsub.s32 %v1279_v14, %v1282_v13  ;;  %v1351_v28 = vor.u32 %v1350_v49, %v1349_v57  ;;  %v3208_v16 = vpop.eup %2384  ;;  %v1208_v6 = vadd.s32 3, %v1204_v12 }
 0x22f   : > { %2386 = vcosq.f32 %v1203_v33  ;;  %v1354_v15 = vor.u32 %v1353_v19, %v1352_v5  ;;  %v1331_v21 = vor.u32 8388608, %v1330_v27  ;;  %v1339_v18 = vshrl.u32 %v2447_v45, %v1338_v58 }
 0x230   : > { %2388 = vsinq.f32 %v1203_v33  ;;  %v1285_v2 = vsub.s32 0, %v3204_v1  ;;  %vm1355_vm12 = vcmp.lt.s32.totalorder %v3179_v24, 1  ;;  %vm1357_vm13 = vcmp.lt.s32.totalorder %v3179_v24, 3 }
 0x231   : > { %vm1358_vm14 = vcmp.lt.s32.totalorder %v3179_v24, 4  ;;  %v1363_v63 = vsel %vm1355_vm12, %v1342_v34, %v1345_v23  ;;  %v1209_v25 = vand.u32 3, %v1208_v6  ;;  %v1367_v42 = vsel %vm1355_vm12, %v1345_v23, %v1348_v35 }
 0x232   : > { %v2228_v53 = vmin.u32 %v1285_v2, %v3204_v1  ;;  %v1360_v22 = vsel %vm1358_vm14, %v1348_v35, 2102212464  ;;  %v1364_v39 = vsel %vm1358_vm14, %v1351_v28, 920167782  ;;  %v1368_v14 = vsel %vm1358_vm14, %v1354_v15, 1326507024 }
 0x233   : > { %v1365_v32 = vsel %vm1357_vm13, %v1348_v35, %v1364_v39  ;;  %vm1356_vm15 = vcmp.lt.s32.totalorder %v3179_v24, 2  ;;  %v1359_v58 = vsel %vm1355_vm12, %v1339_v18, %v1342_v34  ;;  %v1371_v17 = vshll.u32 %v1331_v21, 8 }
 0x234   : > { %v1287_v27 = vclz %v2228_v53  ;;  %v1361_v26 = vsel %vm1357_vm13, %v1345_v23, %v1360_v22  ;;  %v1366_v43 = vsel %vm1356_vm15, %v1363_v63, %v1365_v32  ;;  %v1369_v12 = vsel %vm1357_vm13, %v1351_v28, %v1368_v14 }
 0x235   : > { %v1430_v44 = vand.u32 2139095040, %v3216_v8  ;;  %v1370_v56 = vsel %vm1356_vm15, %v1367_v42, %v1369_v12  ;;  %v3226_v60 = vmul.u32.u64.low %v1371_v17, %v1366_v43  ;;  %v3227_v38 = vmul.u32.u64.high %v1371_v17, %v1366_v43, %v3226_v60 }
 0x236   : > { %v2229_v30 = vadd.s32 4294967294, %v1287_v27  ;;  %v3230_v51 = vmul.u32.u64.low %v1371_v17, %v1370_v56  ;;  %v3231_v29 = vmul.u32.u64.high %v1371_v17, %v1370_v56, %v3230_v51  ;;  %vm3235_vm0 = vcmp.le.f32.partialorder %v1219_v11, 0.7853982 }
 0x237   : > { %v1431_v46 = vshrl.u32 %v1430_v44, 23  ;;  %vm1221_vm1 = vcmp.lt.s32.totalorder %v3059_v48, 0  ;;  %v1362_v24 = vsel %vm1356_vm15, %v1359_v58, %v1361_v26  ;;  %vm1214_vm3 = vcmp.eq.s32.totalorder %v1209_v25, 2 }
 0x238   : > { %vm2230_vm2 = vcmp.lt.s32.totalorder %v2229_v30, 0  ;;  %v1305_v40 = vsub.s32 4, %v3186_v37  ;;  %v1275_v34 = vadd.s32 %v3151_v4, %v3160_v36  ;;  %v1381_v13 = vadd.s32 1, %v3227_v38 }
 0x239   : > { %v1290_v20 = vsel %vm2230_vm2, 0, %v2229_v30  ;;  %v2235_v0 = vadd.s32 4294967169, %v1431_v46  ;;  %v1378_v11 = vmul.u32 %v1371_v17, %v1362_v24  ;;  %vm1380_vm4 = vc.u32 %v3231_v29, %v3226_v60 }
 0x23a   : > { %v1291_v3 = vsub.s32 32, %v1290_v20  ;;  %v1295_v55 = vsub.s32 4294967266, %v1290_v20  ;;  %v1427_v57 = vand.u32 2147483647, %v3216_v8  ;;  %v1292_v23 = vshll.u32 %v3204_v1, %v1290_v20 }
 0x23b   : > { %v1437_v49 = vadd.s32 1, %v2235_v0  ;;  %v1382_v33 = vsel %vm1380_vm4, %v1381_v13, %v3227_v38  ;;  %v1306_v36 = vsel %vm1221_vm1, %v1305_v40, %v3186_v37  ;;  %vm1211_vm6 = vcmp.eq.s32.totalorder %v1209_v25, 0  ;;  %v3275_v13 = vpop.f32.mrf.mxu1 }
 0x23c   : > { %v2387_v59 = vpop.eup %2386  ;;  %v1293_v5 = vshrl.u32 %v1275_v34, %v1291_v3  ;;  %v1296_v19 = vadd.s32 127, %v1295_v55  ;;  %v1383_v28 = vadd.s32 %v1382_v33, %v1378_v11  ;;  %vm1210_vm7 = vcmp.lt.s32.totalorder %v1209_v25, 2 }
 0x23d   : > { %v2389_v35 = vpop.eup %2388  ;;  %v1215_v4 = vxor.u32 2147483648, %v2387_v59  ;;  %vm1438_vm5 = vcmp.gt.s32.totalorder %v1437_v49, 0  ;;  %v1308_v39 = vsel %vm3235_vm0, 0, %v1306_v36  ;;  %vm1207_vm8 = vweird.f32 %v2952_v31 }
 0x23e   : > { %v1212_v6 = vxor.u32 2147483648, %v2389_v35  ;;  %v1294_v15 = vor.u32 %v1293_v5, %v1292_v23  ;;  %v1297_v2 = vshll.u32 %v1296_v19, 23  ;;  %v1439_v21 = vsel %vm1438_vm5, %v1437_v49, 0 }
 0x23f   : > { %v1216_v18 = vsel %vm1214_vm3, %v1215_v4, %v2389_v35  ;;  %v1384_v1 = vadd.s32 536870912, %v1383_v28  ;;  %v1441_v53 = vand.u32 31, %v1439_v21  ;;  %v1434_v17 = vand.u32 8388607, %v1427_v57 }
 0x240   : > { %v1213_v22 = vsel %vm1211_vm6, %v2387_v59, %v1212_v6  ;;  %v1298_v63 = vor.u32 4788187, %v1297_v2  ;;  %v1301_v58 = vcvt.s32.f32 %v1294_v15  ;;  %v1312_v26 = vadd.s32 3, %v1308_v39  ;;  %v3287_v6 = vpop.f32.mrf.mxu1 }
 0x241   : > { %v1217_v37 = vsel %vm1210_vm7, %v1213_v22, %v1216_v18  ;;  %v3256_v32 = vshrl.u32 %v1384_v1, 30  ;;  %v1442_v42 = vsub.s32 32, %v1441_v53  ;;  %v2067_v43 = vmul.f32 1.442695, %v3087_v10 }
 0x242   : > { %v1218_v14 = vsel %vm1207_vm8, nan, %v1217_v37  ;;  %v1299_v27 = vand.u32 2147483647, %v1298_v63  ;;  %v1444_v51 = vshll.u32 %v2447_v45, %v1441_v53  ;;  %v1447_v46 = vshll.u32 %v2448_v47, %v1441_v53 }
 0x243   : > { %v2090_v25 = vmul.f32 %v3208_v16, %v1218_v14  ;;  %v1386_v12 = vshll.u32 %v3256_v32, 30  ;;  %v1445_v31 = vshrl.u32 %v2448_v47, %v1442_v42  ;;  %v1448_v30 = vshrl.u32 %v2449_v50, %v1442_v42 }
 0x244   : > { %v1302_v44 = vmul.f32 %v1301_v58, %v1299_v27  ;;  %v1451_v56 = vshrl.u32 %v2450_v52, %v1442_v42  ;;  %v1454_v16 = vshrl.u32 %v2451_v54, %v1442_v42  ;;  %v1435_v10 = vor.u32 8388608, %v1434_v17 }
 0x245   : > { %2106 = vst [vmem:[%s2752_s25 + $0x38] sm:$0xff] %v2090_v25  ;;  %v3267_v38 = vsub.s32 %v1383_v28, %v1386_v12  ;;  %v1440_v20 = vshrl.u32 %v1439_v21, 5  ;;  %v1450_v40 = vshll.u32 %v2449_v50, %v1441_v53  ;;  %v1446_v34 = vor.u32 %v1445_v31, %v1444_v51 }
 0x246   : > { %v1303_v24 = vxor.u32 2147483648, %v1302_v44  ;;  %v1449_v3 = vor.u32 %v1448_v30, %v1447_v46  ;;  %v1453_v55 = vshll.u32 %v2450_v52, %v1441_v53  ;;  %v1456_v59 = vshll.u32 %v2451_v54, %v1441_v53 }
 0x247   : > { %v1389_v0 = vsub.s32 0, %v3267_v38  ;;  %v1452_v49 = vor.u32 %v1451_v56, %v1450_v40  ;;  %v1457_v23 = vshrl.u32 %v2452_v61, %v1442_v42  ;;  %2390 = vpow2.f32 %v2067_v43 }
 0x248   : > { %v1304_v11 = vsel %vm1221_vm1, %v1303_v24, %v1302_v44  ;;  %v1455_v33 = vor.u32 %v1454_v16, %v1453_v55  ;;  %v3285_v35 = vand.u32 3, %v1312_v26  ;;  %v1475_v36 = vshll.u32 %v1435_v10, 8 }
 0x249   : > { %v1307_v5 = vsel %vm3235_vm0, %v3059_v48, %v1304_v11  ;;  %v2232_v19 = vmin.u32 %v1389_v0, %v3267_v38  ;;  %v1458_v4 = vor.u32 %v1457_v23, %v1456_v59  ;;  %vm1459_vm9 = vcmp.lt.s32.totalorder %v1440_v20, 1 }
 0x24a   : > { %2392 = vcosq.f32 %v1307_v5  ;;  %vm1462_vm10 = vcmp.lt.s32.totalorder %v1440_v20, 4  ;;  %v1443_v15 = vshrl.u32 %v2447_v45, %v1442_v42  ;;  %vm1460_vm11 = vcmp.lt.s32.totalorder %v1440_v20, 2 }
 0x24b   : > { %2394 = vsinq.f32 %v1307_v5  ;;  %v1391_v28 = vclz %v2232_v19  ;;  %v1464_v62 = vsel %vm1462_vm10, %v1452_v49, 2102212464  ;;  %v1467_v2 = vsel %vm1459_vm9, %v1446_v34, %v1449_v3 }
 0x24c   : > { %vm1461_vm12 = vcmp.lt.s32.totalorder %v1440_v20, 3  ;;  %v1468_v18 = vsel %vm1462_vm10, %v1455_v33, 920167782  ;;  %v1471_v1 = vsel %vm1459_vm9, %v1449_v3, %v1452_v49  ;;  %v1463_v53 = vsel %vm1459_vm9, %v1443_v15, %v1446_v34 }
 0x24d   : > { %v2233_v21 = vadd.s32 4294967294, %v1391_v28  ;;  %v1469_v22 = vsel %vm1461_vm12, %v1452_v49, %v1468_v18  ;;  %v1472_v63 = vsel %vm1462_vm10, %v1458_v4, 1326507024  ;;  %v1534_v39 = vand.u32 2139095040, %v3287_v6  ;;  %v3323_v4 = vpop.f32.mrf.mxu1 }
 0x24e   : > { %v1465_v37 = vsel %vm1461_vm12, %v1449_v3, %v1464_v62  ;;  %v1470_v14 = vsel %vm1460_vm11, %v1467_v2, %v1469_v22  ;;  %v1473_v27 = vsel %vm1461_vm12, %v1455_v33, %v1472_v63  ;;  %v1379_v26 = vadd.s32 %v3226_v60, %v3231_v29 }
 0x24f   : > { %vm2234_vm13 = vcmp.lt.s32.totalorder %v2233_v21, 0  ;;  %v1474_v42 = vsel %vm1460_vm11, %v1471_v1, %v1473_v27  ;;  %v3293_v17 = vmul.u32.u64.low %v1475_v36, %v1470_v14  ;;  %v3294_v25 = vmul.u32.u64.high %v1475_v36, %v1470_v14, %v3293_v17 }
 0x250   : > { %v1394_v58 = vsel %vm2234_vm13, 0, %v2233_v21  ;;  %v1535_v44 = vshrl.u32 %v1534_v39, 23  ;;  %v1409_v31 = vsub.s32 4, %v3256_v32  ;;  %v1466_v30 = vsel %vm1460_vm11, %v1463_v53, %v1465_v37  ;;  %v3335_v37 = vpop.f32.mrf.mxu1 }
 0x251   : > { %v1395_v43 = vsub.s32 32, %v1394_v58  ;;  %v1399_v12 = vsub.s32 4294967266, %v1394_v58  ;;  %v3301_v56 = vmul.u32.u64.low %v1475_v36, %v1474_v42  ;;  %v3302_v51 = vmul.u32.u64.high %v1475_v36, %v1474_v42, %v3301_v56 }
 0x252   : > { %v1396_v46 = vshll.u32 %v3267_v38, %v1394_v58  ;;  %v2239_v10 = vadd.s32 4294967169, %v1535_v44  ;;  %v1485_v40 = vadd.s32 1, %v3294_v25  ;;  %v1531_v0 = vand.u32 2147483647, %v3287_v6 }
 0x253   : > { %v1397_v16 = vshrl.u32 %v1379_v26, %v1395_v43  ;;  %v1400_v24 = vadd.s32 127, %v1399_v12  ;;  %vm1325_vm14 = vcmp.lt.s32.totalorder %v3099_v41, 0  ;;  %vm1318_vm15 = vcmp.eq.s32.totalorder %v3285_v35, 2 }
 0x254   : > { %v1541_v34 = vadd.s32 1, %v2239_v10  ;;  %v2391_v3 = vpop.eup %2390  ;;  %vm3311_vm0 = vcmp.le.f32.partialorder %v1323_v9, 0.7853982  ;;  %v1482_v38 = vmul.u32 %v1475_v36, %v1466_v30  ;;  %vm1484_vm1 = vc.u32 %v3302_v51, %v3293_v17 }
 0x255   : > { %v1398_v60 = vor.u32 %v1397_v16, %v1396_v46  ;;  %v1401_v29 = vshll.u32 %v1400_v24, 23  ;;  %v1410_v49 = vsel %vm1325_vm14, %v1409_v31, %v3256_v32  ;;  %v1486_v59 = vsel %vm1484_vm1, %v1485_v40, %v3294_v25 }
 0x256   : > { %vm1542_vm2 = vcmp.gt.s32.totalorder %v1541_v34, 0  ;;  %v1487_v19 = vadd.s32 %v1486_v59, %v1482_v38  ;;  %v1538_v9 = vand.u32 8388607, %v1531_v0  ;;  %vm1315_vm3 = vcmp.eq.s32.totalorder %v3285_v35, 0 }
 0x257   : > { %v2393_v55 = vpop.eup %2392  ;;  %v1402_v11 = vor.u32 4788187, %v1401_v29  ;;  %v1543_v33 = vsel %vm1542_vm2, %v1541_v34, 0  ;;  %v1405_v15 = vcvt.s32.f32 %v1398_v60  ;;  %v1412_v2 = vsel %vm3311_vm0, 0, %v1410_v49 }
 0x258   : > { %v2395_v23 = vpop.eup %2394  ;;  %v1319_v5 = vxor.u32 2147483648, %v2393_v55  ;;  %v1545_v62 = vand.u32 31, %v1543_v33  ;;  %v1488_v21 = vadd.s32 536870912, %v1487_v19  ;;  %vm1314_vm4 = vcmp.lt.s32.totalorder %v3285_v35, 2 }
 0x259   : > { %v1316_v36 = vxor.u32 2147483648, %v2395_v23  ;;  %v1403_v28 = vand.u32 2147483647, %v1402_v11  ;;  %vm1311_vm5 = vweird.f32 %v3059_v48  ;;  %v2069_v63 = vmul.f32 1.442695, %v3206_v7 }
 0x25a   : > { %v1320_v32 = vsel %vm1318_vm15, %v1319_v5, %v2395_v23  ;;  %v1546_v53 = vsub.s32 32, %v1545_v62  ;;  %v3333_v39 = vshrl.u32 %v1488_v21, 30  ;;  %v1416_v58 = vadd.s32 3, %v1412_v2 }
 0x25b   : > { %v1317_v18 = vsel %vm1315_vm3, %v2393_v55, %v1316_v36  ;;  %v1406_v1 = vmul.f32 %v1405_v15, %v1403_v28  ;;  %v1539_v42 = vor.u32 8388608, %v1538_v9  ;;  %v1544_v12 = vshrl.u32 %v1543_v33, 5 }
 0x25c   : > { %v1321_v22 = vsel %vm1314_vm4, %v1317_v18, %v1320_v32  ;;  %v1490_v35 = vshll.u32 %v3333_v39, 30  ;;  %v1549_v26 = vshrl.u32 %v2448_v47, %v1546_v53  ;;  %v1552_v43 = vshrl.u32 %v2449_v50, %v1546_v53 }
 0x25d   : > { %v1322_v14 = vsel %vm1311_vm5, nan, %v1321_v22  ;;  %v1407_v27 = vxor.u32 2147483648, %v1406_v1  ;;  %v1555_v7 = vshrl.u32 %v2450_v52, %v1546_v53  ;;  %v1638_v44 = vand.u32 2139095040, %v3335_v37 }
 0x25e   : > { %v2091_v25 = vmul.f32 %v2391_v3, %v1322_v14  ;;  %v3348_v30 = vsub.s32 %v1487_v19, %v1490_v35  ;;  %v1548_v56 = vshll.u32 %v2447_v45, %v1545_v62  ;;  %v1551_v46 = vshll.u32 %v2448_v47, %v1545_v62 }
 0x25f   : > { %v1408_v48 = vsel %vm1325_vm14, %v1407_v27, %v1406_v1  ;;  %v1554_v16 = vshll.u32 %v2449_v50, %v1545_v62  ;;  %v1557_v24 = vshll.u32 %v2450_v52, %v1545_v62  ;;  %v1558_v10 = vshrl.u32 %v2451_v54, %v1546_v53 }
 0x260   : > { %2107 = vst [vmem:[%s2752_s25 + $0x40] sm:$0xff] %v2091_v25  ;;  %v1411_v31 = vsel %vm3311_vm0, %v3099_v41, %v1408_v48  ;;  %v1493_v40 = vsub.s32 0, %v3348_v30  ;;  %v1550_v60 = vor.u32 %v1549_v26, %v1548_v56  ;;  %v1553_v29 = vor.u32 %v1552_v43, %v1551_v46 }
 0x261   : > { %2396 = vcosq.f32 %v1411_v31  ;;  %v1556_v34 = vor.u32 %v1555_v7, %v1554_v16  ;;  %v1559_v3 = vor.u32 %v1558_v10, %v1557_v24  ;;  %v1560_v20 = vshll.u32 %v2451_v54, %v1545_v62 }
 0x262   : > { %2398 = vsinq.f32 %v1411_v31  ;;  %v1561_v38 = vshrl.u32 %v2452_v61, %v1546_v53  ;;  %v3358_v55 = vand.u32 3, %v1416_v58  ;;  %v2236_v11 = vmin.u32 %v1493_v40, %v3348_v30 }
 0x263   : > { %2400 = vpow2.f32 %v2069_v63  ;;  %v1579_v49 = vshll.u32 %v1539_v42, 8  ;;  %v1547_v59 = vshrl.u32 %v2447_v45, %v1546_v53  ;;  %vm1563_vm6 = vcmp.lt.s32.totalorder %v1544_v12, 1 }
 0x264   : > { %v1562_v23 = vor.u32 %v1561_v38, %v1560_v20  ;;  %v1639_v5 = vshrl.u32 %v1638_v44, 23  ;;  %v1495_v19 = vclz %v2236_v11  ;;  %vm1565_vm7 = vcmp.lt.s32.totalorder %v1544_v12, 3 }
 0x265   : > { %vm1566_vm8 = vcmp.lt.s32.totalorder %v1544_v12, 4  ;;  %v1571_v9 = vsel %vm1563_vm6, %v1550_v60, %v1553_v29  ;;  %v1575_v28 = vsel %vm1563_vm6, %v1553_v29, %v1556_v34  ;;  %vm1564_vm9 = vcmp.lt.s32.totalorder %v1544_v12, 2 }
 0x266   : > { %v1568_v33 = vsel %vm1566_vm8, %v1556_v34, 2102212464  ;;  %v1572_v36 = vsel %vm1566_vm8, %v1559_v3, 920167782  ;;  %v1576_v15 = vsel %vm1566_vm8, %v1562_v23, 1326507024  ;;  %v1567_v21 = vsel %vm1563_vm6, %v1547_v59, %v1550_v60 }
 0x267   : > { %v2237_v62 = vadd.s32 4294967294, %v1495_v19  ;;  %v1573_v32 = vsel %vm1565_vm7, %v1556_v34, %v1572_v36  ;;  %v1577_v2 = vsel %vm1565_vm7, %v1559_v3, %v1576_v15  ;;  %v2243_v53 = vadd.s32 4294967169, %v1639_v5 }
 0x268   : > { %v1574_v18 = vsel %vm1564_vm9, %v1571_v9, %v1573_v32  ;;  %v1578_v1 = vsel %vm1564_vm9, %v1575_v28, %v1577_v2  ;;  %v1569_v22 = vsel %vm1565_vm7, %v1553_v29, %v1568_v33  ;;  %vm1415_vm11 = vweird.f32 %v3099_v41 }
 0x269   : > { %vm2238_vm10 = vcmp.lt.s32.totalorder %v2237_v62, 0  ;;  %v3367_v63 = vmul.u32.u64.low %v1579_v49, %v1578_v1  ;;  %v3368_v14 = vmul.u32.u64.high %v1579_v49, %v1578_v1, %v3367_v63  ;;  %v1645_v25 = vadd.s32 1, %v2243_v53 }
 0x26a   : > { %v1498_v27 = vsel %vm2238_vm10, 0, %v2237_v62  ;;  %v3371_v58 = vmul.u32.u64.low %v1579_v49, %v1574_v18  ;;  %v3372_v42 = vmul.u32.u64.high %v1579_v49, %v1574_v18, %v3371_v58  ;;  %vm1429_vm12 = vcmp.lt.s32.totalorder %v3216_v8, 0 }
 0x26b   : > { %v1483_v35 = vadd.s32 %v3293_v17, %v3302_v51  ;;  %v1499_v26 = vsub.s32 32, %v1498_v27  ;;  %v1503_v43 = vsub.s32 4294967266, %v1498_v27  ;;  %vm1419_vm13 = vcmp.eq.s32.totalorder %v3358_v55, 0 }
 0x26c   : > { %vm1422_vm14 = vcmp.eq.s32.totalorder %v3358_v55, 2  ;;  %v1570_v48 = vsel %vm1564_vm9, %v1567_v21, %v1569_v22  ;;  %vm1646_vm15 = vcmp.gt.s32.totalorder %v1645_v25, 0  ;;  %v1500_v44 = vshll.u32 %v3348_v30, %v1498_v27 }
 0x26d   : > { %v1501_v31 = vshrl.u32 %v1483_v35, %v1499_v26  ;;  %v1504_v56 = vadd.s32 127, %v1503_v43  ;;  %vm1588_vm0 = vc.u32 %v3368_v14, %v3371_v58  ;;  %v1589_v17 = vadd.s32 1, %v3372_v42 }
 0x26e   : > { %v2397_v7 = vpop.eup %2396  ;;  %v1635_v51 = vand.u32 2147483647, %v3335_v37  ;;  %v1647_v24 = vsel %vm1646_vm15, %v1645_v25, 0  ;;  %v1586_v60 = vmul.u32 %v1579_v49, %v1570_v48  ;;  %vm3390_vm1 = vcmp.le.f32.partialorder %v1427_v57, 0.7853982 }
 0x26f   : > { %v2399_v46 = vpop.eup %2398  ;;  %v1423_v16 = vxor.u32 2147483648, %v2397_v7  ;;  %v1502_v40 = vor.u32 %v1501_v31, %v1500_v44  ;;  %v1505_v12 = vshll.u32 %v1504_v56, 23  ;;  %v1513_v3 = vsub.s32 4, %v3333_v39 }
 0x270   : > { %v1420_v10 = vxor.u32 2147483648, %v2399_v46  ;;  %v2401_v29 = vpop.eup %2400  ;;  %v1590_v20 = vsel %vm1588_vm0, %v1589_v17, %v3372_v42  ;;  %v1649_v38 = vand.u32 31, %v1647_v24  ;;  %vm1418_vm2 = vcmp.lt.s32.totalorder %v3358_v55, 2 }
 0x271   : > { %v1424_v30 = vsel %vm1422_vm14, %v1423_v16, %v2399_v46  ;;  %v1506_v49 = vor.u32 4788187, %v1505_v12  ;;  %v1591_v59 = vadd.s32 %v1590_v20, %v1586_v60  ;;  %v2071_v5 = vmul.f32 1.442695, %v3275_v13 }
 0x272   : > { %v1421_v11 = vsel %vm1419_vm13, %v2397_v7, %v1420_v10  ;;  %v1642_v57 = vand.u32 8388607, %v1635_v51  ;;  %v1650_v19 = vsub.s32 32, %v1649_v38  ;;  %v1509_v36 = vcvt.s32.f32 %v1502_v40 }
 0x273   : > { %v1425_v23 = vsel %vm1418_vm2, %v1421_v11, %v1424_v30  ;;  %v1507_v33 = vand.u32 2147483647, %v1506_v49  ;;  %v1592_v28 = vadd.s32 536870912, %v1591_v59  ;;  %v1514_v55 = vsel %vm1429_vm12, %v1513_v3, %v3333_v39 }
 0x274   : > { %v1426_v9 = vsel %vm1415_vm11, nan, %v1425_v23  ;;  %v1653_v62 = vshrl.u32 %v2448_v47, %v1650_v19  ;;  %v1656_v32 = vshrl.u32 %v2449_v50, %v1650_v19  ;;  %v1652_v21 = vshll.u32 %v2447_v45, %v1649_v38 }
 0x275   : > { %v2092_v15 = vmul.f32 %v2401_v29, %v1426_v9  ;;  %v1510_v13 = vmul.f32 %v1509_v36, %v1507_v33  ;;  %v3409_v2 = vshrl.u32 %v1592_v28, 30  ;;  %v1659_v41 = vshrl.u32 %v2450_v52, %v1650_v19 }
 0x276   : > { %v1648_v18 = vshrl.u32 %v1647_v24, 5  ;;  %v1655_v1 = vshll.u32 %v2448_v47, %v1649_v38  ;;  %v1661_v53 = vshll.u32 %v2450_v52, %v1649_v38  ;;  %v1662_v22 = vshrl.u32 %v2451_v54, %v1650_v19  ;;  %v3431_v24 = vpop.f32.mrf.mxu1 }
 0x277   : > { %2108 = vst [vmem:[%s2752_s25 + $0x48] sm:$0xff] %v2092_v15  ;;  %v1511_v39 = vxor.u32 2147483648, %v1510_v13  ;;  %v1594_v63 = vshll.u32 %v3409_v2, 30  ;;  %v1654_v27 = vor.u32 %v1653_v62, %v1652_v21  ;;  %v1658_v42 = vshll.u32 %v2449_v50, %v1649_v38 }
 0x278   : > { %v1657_v25 = vor.u32 %v1656_v32, %v1655_v1  ;;  %v1663_v35 = vor.u32 %v1662_v22, %v1661_v53  ;;  %v1664_v26 = vshll.u32 %v2451_v54, %v1649_v38  ;;  %v1665_v43 = vshrl.u32 %v2452_v61, %v1650_v19  ;;  %v3439_v11 = vpop.f32.mrf.mxu1 }
 0x279   : > { %v1512_v48 = vsel %vm1429_vm12, %v1511_v39, %v1510_v13  ;;  %v1516_v7 = vsel %vm3390_vm1, 0, %v1514_v55  ;;  %v3425_v44 = vsub.s32 %v1591_v59, %v1594_v63  ;;  %v1660_v31 = vor.u32 %v1659_v41, %v1658_v42 }
 0x27a   : > { %v1515_v56 = vsel %vm3390_vm1, %v3216_v8, %v1512_v48  ;;  %v1643_v46 = vor.u32 8388608, %v1642_v57  ;;  %v1651_v16 = vshrl.u32 %v2447_v45, %v1650_v19  ;;  %v1666_v17 = vor.u32 %v1665_v43, %v1664_v26 }
 0x27b   : > { %2402 = vcosq.f32 %v1515_v56  ;;  %v1597_v10 = vsub.s32 0, %v3425_v44  ;;  %vm1667_vm3 = vcmp.lt.s32.totalorder %v1648_v18, 1  ;;  %vm1670_vm4 = vcmp.lt.s32.totalorder %v1648_v18, 4 }
 0x27c   : > { %2404 = vsinq.f32 %v1515_v56  ;;  %vm1669_vm5 = vcmp.lt.s32.totalorder %v1648_v18, 3  ;;  %v1675_v40 = vsel %vm1667_vm3, %v1654_v27, %v1657_v25  ;;  %v1676_v12 = vsel %vm1670_vm4, %v1663_v35, 920167782 }
 0x27d   : > { %v2240_v60 = vmin.u32 %v1597_v10, %v3425_v44  ;;  %vm1668_vm6 = vcmp.lt.s32.totalorder %v1648_v18, 2  ;;  %v1672_v29 = vsel %vm1670_vm4, %v1660_v31, 2102212464  ;;  %v1677_v30 = vsel %vm1669_vm5, %v1660_v31, %v1676_v12 }
 0x27e   : > { %v1678_v34 = vsel %vm1668_vm6, %v1675_v40, %v1677_v30  ;;  %v1679_v3 = vsel %vm1667_vm3, %v1657_v25, %v1660_v31  ;;  %v1680_v20 = vsel %vm1670_vm4, %v1666_v17, 1326507024  ;;  %v1683_v38 = vshll.u32 %v1643_v46, 8 }
 0x27f   : > { %v1520_v49 = vadd.s32 3, %v1516_v7  ;;  %2406 = vpow2.f32 %v2071_v5  ;;  %v1599_v59 = vclz %v2240_v60  ;;  %v1671_v23 = vsel %vm1667_vm3, %v1651_v16, %v1654_v27 }
 0x280   : > { %v1673_v57 = vsel %vm1669_vm5, %v1657_v25, %v1672_v29  ;;  %v1681_v19 = vsel %vm1669_vm5, %v1663_v35, %v1680_v20  ;;  %v3444_v9 = vmul.u32.u64.low %v1683_v38, %v1678_v34  ;;  %v3445_v33 = vmul.u32.u64.high %v1683_v38, %v1678_v34, %v3444_v9  ;;  %v3469_v25 = vpop.f32.mrf.mxu1 }
 0x281   : > { %v2241_v36 = vadd.s32 4294967294, %v1599_v59  ;;  %v1617_v28 = vsub.s32 4, %v3409_v2  ;;  %v1682_v15 = vsel %vm1668_vm6, %v1679_v3, %v1681_v19  ;;  %v1742_v55 = vand.u32 2139095040, %v3439_v11 }
 0x282   : > { %vm3453_vm7 = vcmp.le.f32.partialorder %v1531_v0, 0.7853982  ;;  %vm1533_vm8 = vcmp.lt.s32.totalorder %v3287_v6, 0  ;;  %v3458_v62 = vmul.u32.u64.low %v1683_v38, %v1682_v15  ;;  %v3459_v32 = vmul.u32.u64.high %v1683_v38, %v1682_v15, %v3458_v62  ;;  %v3478_v16 = vpop.f32.mrf.mxu1 }
 0x283   : > { %vm2242_vm9 = vcmp.lt.s32.totalorder %v2241_v36, 0  ;;  %v2073_v13 = vmul.f32 1.442695, %v3323_v4  ;;  %v1674_v21 = vsel %vm1668_vm6, %v1671_v23, %v1673_v57  ;;  %v1743_v41 = vshrl.u32 %v1742_v55, 23 }
 0x284   : > { %v1521_v1 = vand.u32 3, %v1520_v49  ;;  %v1587_v53 = vadd.s32 %v3371_v58, %v3368_v14  ;;  %v1602_v22 = vsel %vm2242_vm9, 0, %v2241_v36  ;;  %v1693_v0 = vadd.s32 1, %v3445_v33 }
 0x285   : > { %v1603_v39 = vsub.s32 32, %v1602_v22  ;;  %v1607_v63 = vsub.s32 4294967266, %v1602_v22  ;;  %v1618_v27 = vsel %vm1533_vm8, %v1617_v28, %v3409_v2  ;;  %v2247_v42 = vadd.s32 4294967169, %v1743_v41 }
 0x286   : > { %v1604_v4 = vshll.u32 %v3425_v44, %v1602_v22  ;;  %v1690_v18 = vmul.u32 %v1683_v38, %v1674_v21  ;;  %vm1692_vm10 = vc.u32 %v3459_v32, %v3444_v9  ;;  %v1739_v14 = vand.u32 2147483647, %v3439_v11 }
 0x287   : > { %v1605_v58 = vshrl.u32 %v1587_v53, %v1603_v39  ;;  %v1608_v35 = vadd.s32 127, %v1607_v63  ;;  %v1694_v26 = vsel %vm1692_vm10, %v1693_v0, %v3445_v33  ;;  %v1749_v43 = vadd.s32 1, %v2247_v42 }
 0x288   : > { %v2403_v48 = vpop.eup %2402  ;;  %vm1522_vm11 = vcmp.lt.s32.totalorder %v1521_v1, 2  ;;  %vm1523_vm12 = vcmp.eq.s32.totalorder %v1521_v1, 0  ;;  %v1620_v2 = vsel %vm3453_vm7, 0, %v1618_v27  ;;  %v1695_v7 = vadd.s32 %v1694_v26, %v1690_v18 }
 0x289   : > { %v2405_v31 = vpop.eup %2404  ;;  %v1527_v44 = vxor.u32 2147483648, %v2403_v48  ;;  %v1606_v56 = vor.u32 %v1605_v58, %v1604_v4  ;;  %v1609_v46 = vshll.u32 %v1608_v35, 23  ;;  %vm1750_vm13 = vcmp.gt.s32.totalorder %v1749_v43, 0 }
 0x28a   : > { %v1524_v17 = vxor.u32 2147483648, %v2405_v31  ;;  %vm1526_vm14 = vcmp.eq.s32.totalorder %v1521_v1, 2  ;;  %v1696_v10 = vadd.s32 536870912, %v1695_v7  ;;  %v1751_v40 = vsel %vm1750_vm13, %v1749_v43, 0 }
 0x28b   : > { %v1528_v12 = vsel %vm1526_vm14, %v1527_v44, %v2405_v31  ;;  %v1610_v60 = vor.u32 4788187, %v1609_v46  ;;  %v1624_v29 = vadd.s32 3, %v1620_v2  ;;  %v1746_v30 = vand.u32 8388607, %v1739_v14 }
 0x28c   : > { %v2407_v34 = vpop.eup %2406  ;;  %v1525_v3 = vsel %vm1523_vm12, %v2403_v48, %v1524_v17  ;;  %v3483_v20 = vshrl.u32 %v1696_v10, 30  ;;  %v1753_v38 = vand.u32 31, %v1751_v40  ;;  %v1846_v49 = vand.u32 2139095040, %v3478_v16 }
 0x28d   : > { %vm1519_vm15 = vweird.f32 %v3216_v8  ;;  %v1529_v59 = vsel %vm1522_vm11, %v1525_v3, %v1528_v12  ;;  %v1611_v23 = vand.u32 2147483647, %v1610_v60  ;;  %v1613_v57 = vcvt.s32.f32 %v1606_v56 }
 0x28e   : > { %v1530_v19 = vsel %vm1519_vm15, nan, %v1529_v59  ;;  %v1698_v33 = vshll.u32 %v3483_v20, 30  ;;  %v1754_v36 = vsub.s32 32, %v1753_v38  ;;  %v3489_v55 = vand.u32 3, %v1624_v29 }
 0x28f   : > { %v2093_v28 = vmul.f32 %v2407_v34, %v1530_v19  ;;  %v1614_v15 = vmul.f32 %v1613_v57, %v1611_v23  ;;  %2408 = vpow2.f32 %v2073_v13  ;;  %v1747_v21 = vor.u32 8388608, %v1746_v30 }
 0x290   : > { %v3491_v62 = vsub.s32 %v1695_v7, %v1698_v33  ;;  %v1757_v41 = vshrl.u32 %v2448_v47, %v1754_v36  ;;  %v1847_v53 = vshrl.u32 %v1846_v49, 23  ;;  %v1752_v1 = vshrl.u32 %v1751_v40, 5 }
 0x291   : > { %2109 = vst [vmem:[%s2752_s25 + $0x50] sm:$0xff] %v2093_v28  ;;  %v1615_v8 = vxor.u32 2147483648, %v1614_v15  ;;  %v1756_v22 = vshll.u32 %v2447_v45, %v1753_v38  ;;  %v1760_v0 = vshrl.u32 %v2449_v50, %v1754_v36  ;;  %v1759_v63 = vshll.u32 %v2448_v47, %v1753_v38 }
 0x292   : > { %v1701_v39 = vsub.s32 0, %v3491_v62  ;;  %v1762_v27 = vshll.u32 %v2449_v50, %v1753_v38  ;;  %v1763_v13 = vshrl.u32 %v2450_v52, %v1754_v36  ;;  %v1765_v18 = vshll.u32 %v2450_v52, %v1753_v38 }
 0x293   : > { %v1616_v42 = vsel %vm1533_vm8, %v1615_v8, %v1614_v15  ;;  %v1758_v4 = vor.u32 %v1757_v41, %v1756_v22  ;;  %v1766_v58 = vshrl.u32 %v2451_v54, %v1754_v36  ;;  %v1761_v43 = vor.u32 %v1760_v0, %v1759_v63 }
 0x294   : > { %v1619_v35 = vsel %vm3453_vm7, %v3287_v6, %v1616_v42  ;;  %v2244_v26 = vmin.u32 %v1701_v39, %v3491_v62  ;;  %v1764_v48 = vor.u32 %v1763_v13, %v1762_v27  ;;  %v1768_v7 = vshll.u32 %v2451_v54, %v1753_v38 }
 0x295   : > { %2410 = vcosq.f32 %v1619_v35  ;;  %v1767_v2 = vor.u32 %v1766_v58, %v1765_v18  ;;  %v1769_v31 = vshrl.u32 %v2452_v61, %v1754_v36  ;;  %v1691_v44 = vadd.s32 %v3444_v9, %v3459_v32 }
 0x296   : > { %2412 = vsinq.f32 %v1619_v35  ;;  %v1703_v56 = vclz %v2244_v26  ;;  %v1787_v46 = vshll.u32 %v1747_v21, 8  ;;  %vm1771_vm0 = vcmp.lt.s32.totalorder %v1752_v1, 1 }
 0x297   : > { %v1770_v17 = vor.u32 %v1769_v31, %v1768_v7  ;;  %vm1772_vm1 = vcmp.lt.s32.totalorder %v1752_v1, 2  ;;  %v2251_v5 = vadd.s32 4294967169, %v1847_v53  ;;  %vm1773_vm2 = vcmp.lt.s32.totalorder %v1752_v1, 3 }
 0x298   : > { %v2245_v10 = vadd.s32 4294967294, %v1703_v56  ;;  %vm1774_vm3 = vcmp.lt.s32.totalorder %v1752_v1, 4  ;;  %v1779_v40 = vsel %vm1771_vm0, %v1758_v4, %v1761_v43  ;;  %v1783_v29 = vsel %vm1771_vm0, %v1761_v43, %v1764_v48 }
 0x299   : > { %v1776_v12 = vsel %vm1774_vm3, %v1764_v48, 2102212464  ;;  %v1780_v60 = vsel %vm1774_vm3, %v1767_v2, 920167782  ;;  %v1784_v30 = vsel %vm1774_vm3, %v1770_v17, 1326507024  ;;  %v1755_v34 = vshrl.u32 %v2447_v45, %v1754_v36 }
 0x29a   : > { %vm2246_vm4 = vcmp.lt.s32.totalorder %v2245_v10, 0  ;;  %v1781_v9 = vsel %vm1773_vm2, %v1764_v48, %v1780_v60  ;;  %v1785_v32 = vsel %vm1773_vm2, %v1767_v2, %v1784_v30  ;;  %v1721_v38 = vsub.s32 4, %v3483_v20 }
 0x29b   : > { %v1706_v3 = vsel %vm2246_vm4, 0, %v2245_v10  ;;  %v1782_v49 = vsel %vm1772_vm1, %v1779_v40, %v1781_v9  ;;  %v1786_v59 = vsel %vm1772_vm1, %v1783_v29, %v1785_v32  ;;  %v1775_v33 = vsel %vm1771_vm0, %v1755_v34, %v1758_v4  ;;  %v3565_v9 = vpop.f32.mrf.mxu1 }
 0x29c   : > { %v2409_v23 = vpop.eup %2408  ;;  %v1707_v57 = vsub.s32 32, %v1706_v3  ;;  %v1711_v19 = vsub.s32 4294967266, %v1706_v3  ;;  %v1777_v28 = vsel %vm1773_vm2, %v1761_v43, %v1776_v12  ;;  %v1708_v53 = vshll.u32 %v3491_v62, %v1706_v3 }
 0x29d   : > { %v3523_v15 = vmul.u32.u64.low %v1787_v46, %v1786_v59  ;;  %v3524_v36 = vmul.u32.u64.high %v1787_v46, %v1786_v59, %v3523_v15  ;;  %v3526_v21 = vmul.u32.u64.low %v1787_v46, %v1782_v49  ;;  %v3527_v41 = vmul.u32.u64.high %v1787_v46, %v1782_v49, %v3526_v21 }
 0x29e   : > { %v1709_v8 = vshrl.u32 %v1691_v44, %v1707_v57  ;;  %v1712_v22 = vadd.s32 127, %v1711_v19  ;;  %v1853_v0 = vadd.s32 1, %v2251_v5  ;;  %vm1623_vm5 = vweird.f32 %v3287_v6 }
 0x29f   : > { %vm3534_vm6 = vcmp.le.f32.partialorder %v1635_v51, 0.7853982  ;;  %vm1637_vm7 = vcmp.lt.s32.totalorder %v3335_v37, 0  ;;  %v3540_v63 = vmul.f32 1.442695, %v3431_v24  ;;  %v1778_v27 = vsel %vm1772_vm1, %v1775_v33, %v1777_v28 }
 0x2a0   : > { %vm1626_vm8 = vcmp.lt.s32.totalorder %v3489_v55, 2  ;;  %v1710_v62 = vor.u32 %v1709_v8, %v1708_v53  ;;  %v1713_v13 = vshll.u32 %v1712_v22, 23  ;;  %vm1854_vm9 = vcmp.gt.s32.totalorder %v1853_v0, 0  ;;  %v3585_v22 = vpop.f32.mrf.mxu1 }
 0x2a1   : > { %vm1796_vm10 = vc.u32 %v3524_v36, %v3526_v21  ;;  %v1797_v51 = vadd.s32 1, %v3527_v41  ;;  %v1843_v42 = vand.u32 2147483647, %v3478_v16  ;;  %v1855_v4 = vsel %vm1854_vm9, %v1853_v0, 0 }
 0x2a2   : > { %v2411_v18 = vpop.eup %2410  ;;  %v1714_v58 = vor.u32 4788187, %v1713_v13  ;;  %v1722_v24 = vsel %vm1637_vm7, %v1721_v38, %v3483_v20  ;;  %v1794_v1 = vmul.u32 %v1787_v46, %v1778_v27  ;;  %v1857_v35 = vand.u32 31, %v1855_v4 }
 0x2a3   : > { %v2413_v26 = vpop.eup %2412  ;;  %vm1630_vm11 = vcmp.eq.s32.totalorder %v3489_v55, 2  ;;  %v1631_v43 = vxor.u32 2147483648, %v2411_v18  ;;  %v1717_v48 = vcvt.s32.f32 %v1710_v62  ;;  %v1798_v2 = vsel %vm1796_vm10, %v1797_v51, %v3527_v41 }
 0x2a4   : > { %v1628_v7 = vxor.u32 2147483648, %v2413_v26  ;;  %v1715_v31 = vand.u32 2147483647, %v1714_v58  ;;  %v1799_v44 = vadd.s32 %v1798_v2, %v1794_v1  ;;  %v1858_v56 = vsub.s32 32, %v1857_v35 }
 0x2a5   : > { %vm1627_vm12 = vcmp.eq.s32.totalorder %v3489_v55, 0  ;;  %v1632_v17 = vsel %vm1630_vm11, %v1631_v43, %v2413_v26  ;;  %v1724_v5 = vsel %vm3534_vm6, 0, %v1722_v24  ;;  %v1850_v20 = vand.u32 8388607, %v1843_v42 }
 0x2a6   : > { %v1629_v46 = vsel %vm1627_vm12, %v2411_v18, %v1628_v7  ;;  %v1718_v10 = vmul.f32 %v1717_v48, %v1715_v31  ;;  %v1800_v40 = vadd.s32 536870912, %v1799_v44  ;;  %v3558_v12 = vshrl.u32 %v1855_v4, 5 }
 0x2a7   : > { %v1633_v60 = vsel %vm1626_vm8, %v1629_v46, %v1632_v17  ;;  %v1860_v29 = vshll.u32 %v2447_v45, %v1857_v35  ;;  %v1861_v30 = vshrl.u32 %v2448_v47, %v1858_v56  ;;  %v1864_v34 = vshrl.u32 %v2449_v50, %v1858_v56 }
 0x2a8   : > { %v1634_v32 = vsel %vm1623_vm5, nan, %v1633_v60  ;;  %v1719_v3 = vxor.u32 2147483648, %v1718_v10  ;;  %v3569_v38 = vshrl.u32 %v1800_v40, 30  ;;  %v1867_v49 = vshrl.u32 %v2450_v52, %v1858_v56 }
 0x2a9   : > { %v2094_v59 = vmul.f32 %v2409_v23, %v1634_v32  ;;  %v1863_v55 = vshll.u32 %v2448_v47, %v1857_v35  ;;  %v1866_v57 = vshll.u32 %v2449_v50, %v1857_v35  ;;  %v1869_v19 = vshll.u32 %v2450_v52, %v1857_v35 }
 0x2aa   : > { %v1720_v33 = vsel %vm1637_vm7, %v1719_v3, %v1718_v10  ;;  %v1802_v28 = vshll.u32 %v3569_v38, 30  ;;  %v1862_v15 = vor.u32 %v1861_v30, %v1860_v29  ;;  %v1870_v6 = vshrl.u32 %v2451_v54, %v1858_v56 }
 0x2ab   : > { %2110 = vst [vmem:[%s2752_s25 + $0x58] sm:$0xff] %v2094_v59  ;;  %v1723_v41 = vsel %vm3534_vm6, %v3335_v37, %v1720_v33  ;;  %v1865_v23 = vor.u32 %v1864_v34, %v1863_v55  ;;  %v1872_v53 = vshll.u32 %v2451_v54, %v1857_v35  ;;  %v1873_v8 = vshrl.u32 %v2452_v61, %v1858_v56 }
 0x2ac   : > { %2414 = vcosq.f32 %v1723_v41  ;;  %v3587_v0 = vsub.s32 %v1799_v44, %v1802_v28  ;;  %v1868_v27 = vor.u32 %v1867_v49, %v1866_v57  ;;  %v1871_v62 = vor.u32 %v1870_v6, %v1869_v19 }
 0x2ad   : > { %2416 = vsinq.f32 %v1723_v41  ;;  %v1728_v13 = vadd.s32 3, %v1724_v5  ;;  %v1851_v51 = vor.u32 8388608, %v1850_v20  ;;  %v1874_v4 = vor.u32 %v1873_v8, %v1872_v53 }
 0x2ae   : > { %v1805_v18 = vsub.s32 0, %v3587_v0  ;;  %vm1875_vm13 = vcmp.lt.s32.totalorder %v3558_v12, 1  ;;  %vm1878_vm14 = vcmp.lt.s32.totalorder %v3558_v12, 4  ;;  %v1950_v39 = vand.u32 2139095040, %v3585_v22 }
 0x2af   : > { %v1859_v58 = vshrl.u32 %v2447_v45, %v1858_v56  ;;  %vm1877_vm15 = vcmp.lt.s32.totalorder %v3558_v12, 3  ;;  %v1883_v24 = vsel %vm1875_vm13, %v1862_v15, %v1865_v23  ;;  %v1884_v1 = vsel %vm1878_vm14, %v1871_v62, 920167782 }
 0x2b0   : > { %v2248_v35 = vmin.u32 %v1805_v18, %v3587_v0  ;;  %vm1876_vm0 = vcmp.lt.s32.totalorder %v3558_v12, 2  ;;  %v1880_v26 = vsel %vm1878_vm14, %v1868_v27, 2102212464  ;;  %v1885_v43 = vsel %vm1877_vm15, %v1868_v27, %v1884_v1 }
 0x2b1   : > { %v1886_v48 = vsel %vm1876_vm0, %v1883_v24, %v1885_v43  ;;  %v1887_v2 = vsel %vm1875_vm13, %v1865_v23, %v1868_v27  ;;  %v1888_v7 = vsel %vm1878_vm14, %v1874_v4, 1326507024  ;;  %v1891_v31 = vshll.u32 %v1851_v51, 8 }
 0x2b2   : > { %v1729_v44 = vand.u32 3, %v1728_v13  ;;  %2418 = vpow2.f32 %v3540_v63  ;;  %v1807_v56 = vclz %v2248_v35  ;;  %v1879_v17 = vsel %vm1875_vm13, %v1859_v58, %v1862_v15 }
 0x2b3   : > { %v1881_v5 = vsel %vm1877_vm15, %v1865_v23, %v1880_v26  ;;  %v1889_v20 = vsel %vm1877_vm15, %v1871_v62, %v1888_v7  ;;  %v3612_v46 = vmul.u32.u64.low %v1891_v31, %v1886_v48  ;;  %v3613_v10 = vmul.u32.u64.high %v1891_v31, %v1886_v48, %v3612_v46 }
 0x2b4   : > { %v2249_v40 = vadd.s32 4294967294, %v1807_v56  ;;  %v1890_v60 = vsel %vm1876_vm0, %v1887_v2, %v1889_v20  ;;  %v1951_v29 = vshrl.u32 %v1950_v39, 23  ;;  %v1882_v34 = vsel %vm1876_vm0, %v1879_v17, %v1881_v5 }
 0x2b5   : > { %v3618_v63 = vmul.u32.u64.low %v1891_v31, %v1890_v60  ;;  %v3619_v30 = vmul.u32.u64.high %v1891_v31, %v1890_v60, %v3618_v63  ;;  %vm1730_vm2 = vcmp.lt.s32.totalorder %v1729_v44, 2  ;;  %vm1731_vm3 = vcmp.eq.s32.totalorder %v1729_v44, 0 }
 0x2b6   : > { %vm2250_vm1 = vcmp.lt.s32.totalorder %v2249_v40, 0  ;;  %v2255_v32 = vadd.s32 4294967169, %v1951_v29  ;;  %v1901_v49 = vadd.s32 1, %v3613_v10  ;;  %v1795_v59 = vadd.s32 %v3526_v21, %v3524_v36 }
 0x2b7   : > { %v1810_v3 = vsel %vm2250_vm1, 0, %v2249_v40  ;;  %vm1734_vm4 = vcmp.eq.s32.totalorder %v1729_v44, 2  ;;  %v1898_v15 = vmul.u32 %v1891_v31, %v1882_v34  ;;  %vm1900_vm5 = vc.u32 %v3619_v30, %v3612_v46 }
 0x2b8   : > { %v1811_v55 = vsub.s32 32, %v1810_v3  ;;  %v1815_v57 = vsub.s32 4294967266, %v1810_v3  ;;  %v1957_v19 = vadd.s32 1, %v2255_v32  ;;  %v1812_v28 = vshll.u32 %v3587_v0, %v1810_v3 }
 0x2b9   : > { %v2415_v33 = vpop.eup %2414  ;;  %v1902_v53 = vsel %vm1900_vm5, %v1901_v49, %v3613_v10  ;;  %v1947_v36 = vand.u32 2147483647, %v3585_v22  ;;  %v1825_v4 = vsub.s32 4, %v3569_v38  ;;  %vm1727_vm7 = vweird.f32 %v3335_v37 }
 0x2ba   : > { %v2417_v12 = vpop.eup %2416  ;;  %v1735_v6 = vxor.u32 2147483648, %v2415_v33  ;;  %v1813_v41 = vshrl.u32 %v1795_v59, %v1811_v55  ;;  %v1816_v23 = vadd.s32 127, %v1815_v57  ;;  %v1903_v27 = vadd.s32 %v1902_v53, %v1898_v15 }
 0x2bb   : > { %v1732_v8 = vxor.u32 2147483648, %v2417_v12  ;;  %vm1958_vm6 = vcmp.gt.s32.totalorder %v1957_v19, 0  ;;  %vm1741_vm8 = vcmp.lt.s32.totalorder %v3439_v11, 0  ;;  %v1954_v31 = vand.u32 8388607, %v1947_v36 }
 0x2bc   : > { %v1736_v21 = vsel %vm1734_vm4, %v1735_v6, %v2417_v12  ;;  %v1814_v62 = vor.u32 %v1813_v41, %v1812_v28  ;;  %v1817_v13 = vshll.u32 %v1816_v23, 23  ;;  %v1959_v51 = vsel %vm1958_vm6, %v1957_v19, 0 }
 0x2bd   : > { %v1733_v0 = vsel %vm1731_vm3, %v2415_v33, %v1732_v8  ;;  %v1904_v18 = vadd.s32 536870912, %v1903_v27  ;;  %v1961_v39 = vand.u32 31, %v1959_v51  ;;  %vm3642_vm9 = vcmp.le.f32.partialorder %v1739_v14, 0.7853982 }
 0x2be   : > { %v1737_v58 = vsel %vm1730_vm2, %v1733_v0, %v1736_v21  ;;  %v1818_v24 = vor.u32 4788187, %v1817_v13  ;;  %v1821_v7 = vcvt.s32.f32 %v1814_v62  ;;  %v1826_v44 = vsel %vm1741_vm8, %v1825_v4, %v3569_v38 }
 0x2bf   : > { %v2419_v1 = vpop.eup %2418  ;;  %v1738_v35 = vsel %vm1727_vm7, nan, %v1737_v58  ;;  %v3636_v26 = vshrl.u32 %v1904_v18, 30  ;;  %v1962_v43 = vsub.s32 32, %v1961_v39  ;;  %v1964_v20 = vshll.u32 %v2447_v45, %v1961_v39 }
 0x2c0   : > { %v2095_v48 = vmul.f32 %v2419_v1, %v1738_v35  ;;  %v1819_v2 = vand.u32 2147483647, %v1818_v24  ;;  %v1967_v60 = vshll.u32 %v2448_v47, %v1961_v39  ;;  %v1970_v29 = vshll.u32 %v2449_v50, %v1961_v39 }
 0x2c1   : > { %v1906_v56 = vshll.u32 %v3636_v26, 30  ;;  %v1965_v17 = vshrl.u32 %v2448_v47, %v1962_v43  ;;  %v1968_v10 = vshrl.u32 %v2449_v50, %v1962_v43  ;;  %v1971_v40 = vshrl.u32 %v2450_v52, %v1962_v43 }
 0x2c2   : > { %2111 = vst [vmem:[%s2752_s25 + $0x60] sm:$0xff] %v2095_v48  ;;  %v1822_v5 = vmul.f32 %v1821_v7, %v1819_v2  ;;  %v1974_v63 = vshrl.u32 %v2451_v54, %v1962_v43  ;;  %v1955_v34 = vor.u32 8388608, %v1954_v31  ;;  %v1960_v32 = vshrl.u32 %v1959_v51, 5 }
 0x2c3   : > { %v1907_v14 = vsub.s32 %v1903_v27, %v1906_v56  ;;  %v1973_v3 = vshll.u32 %v2450_v52, %v1961_v39  ;;  %v1966_v59 = vor.u32 %v1965_v17, %v1964_v20  ;;  %v1969_v55 = vor.u32 %v1968_v10, %v1967_v60 }
 0x2c4   : > { %v1823_v38 = vxor.u32 2147483648, %v1822_v5  ;;  %v1972_v57 = vor.u32 %v1971_v40, %v1970_v29  ;;  %v1976_v28 = vshll.u32 %v2451_v54, %v1961_v39  ;;  %v1977_v47 = vshrl.u32 %v2452_v61, %v1962_v43 }
 0x2c5   : > { %v1909_v49 = vsub.s32 0, %v1907_v14  ;;  %v1975_v33 = vor.u32 %v1974_v63, %v1973_v3  ;;  %v1828_v15 = vsel %vm3642_vm9, 0, %v1826_v44  ;;  %v2077_v52 = vmul.f32 1.442695, %v3469_v25 }
 0x2c6   : > { %v1824_v19 = vsel %vm1741_vm8, %v1823_v38, %v1822_v5  ;;  %v1963_v6 = vshrl.u32 %v2447_v45, %v1962_v43  ;;  %v1978_v41 = vor.u32 %v1977_v47, %v1976_v28  ;;  %v1995_v23 = vshll.u32 %v1955_v34, 8 }
 0x2c7   : > { %v1827_v50 = vsel %vm3642_vm9, %v3439_v11, %v1824_v19  ;;  %v2252_v12 = vmin.u32 %v1909_v49, %v1907_v14  ;;  %vm1979_vm10 = vcmp.lt.s32.totalorder %v1960_v32, 1  ;;  %vm1982_vm11 = vcmp.lt.s32.totalorder %v1960_v32, 4 }
 0x2c8   : > { %2420 = vcosq.f32 %v1827_v50  ;;  %vm1981_vm12 = vcmp.lt.s32.totalorder %v1960_v32, 3  ;;  %v1984_v54 = vsel %vm1982_vm11, %v1972_v57, 2102212464  ;;  %v1987_v61 = vsel %vm1979_vm10, %v1966_v59, %v1969_v55 }
 0x2c9   : > { %2422 = vsinq.f32 %v1827_v50  ;;  %v1911_v53 = vclz %v2252_v12  ;;  %v1988_v8 = vsel %vm1982_vm11, %v1975_v33, 920167782  ;;  %vm1980_vm13 = vcmp.lt.s32.totalorder %v1960_v32, 2 }
 0x2ca   : > { %v1989_v21 = vsel %vm1981_vm12, %v1972_v57, %v1988_v8  ;;  %v1991_v62 = vsel %vm1979_vm10, %v1969_v55, %v1972_v57  ;;  %v1983_v13 = vsel %vm1979_vm10, %v1963_v6, %v1966_v59  ;;  %v1985_v25 = vsel %vm1981_vm12, %v1969_v55, %v1984_v54 }
 0x2cb   : > { %v2253_v27 = vadd.s32 4294967294, %v1911_v53  ;;  %v1990_v51 = vsel %vm1980_vm13, %v1987_v61, %v1989_v21  ;;  %v1992_v0 = vsel %vm1982_vm11, %v1978_v41, 1326507024  ;;  %2424 = vpow2.f32 %v2077_v52 }
 0x2cc   : > { %v1993_v45 = vsel %vm1981_vm12, %v1975_v33, %v1992_v0  ;;  %v3671_v4 = vmul.u32.u64.low %v1995_v23, %v1990_v51  ;;  %v3672_v18 = vmul.u32.u64.high %v1995_v23, %v1990_v51, %v3671_v4  ;;  %v1832_v24 = vadd.s32 3, %v1828_v15 }
 0x2cd   : > { %vm2254_vm14 = vcmp.lt.s32.totalorder %v2253_v27, 0  ;;  %v1994_v58 = vsel %vm1980_vm13, %v1991_v62, %v1993_v45  ;;  %v1899_v1 = vadd.s32 %v3612_v46, %v3619_v30  ;;  %v1986_v48 = vsel %vm1980_vm13, %v1983_v13, %v1985_v25 }
 0x2ce   : > { %v1914_v39 = vsel %vm2254_vm14, 0, %v2253_v27  ;;  %v3679_v2 = vmul.u32.u64.low %v1995_v23, %v1994_v58  ;;  %v3680_v7 = vmul.u32.u64.high %v1995_v23, %v1994_v58, %v3679_v2  ;;  %v2005_v56 = vadd.s32 1, %v3672_v18 }
 0x2cf   : > { %v1915_v35 = vsub.s32 32, %v1914_v39  ;;  %v1919_v43 = vsub.s32 4294967266, %v1914_v39  ;;  %v1916_v31 = vshll.u32 %v1907_v14, %v1914_v39  ;;  %v1833_v17 = vand.u32 3, %v1832_v24 }
 0x2d0   : > { %v2002_v10 = vmul.u32 %v1995_v23, %v1986_v48  ;;  %vm2004_vm15 = vc.u32 %v3680_v7, %v3671_v4  ;;  %vm1831_vm3 = vweird.f32 %v3439_v11  ;;  %vm1845_vm4 = vcmp.lt.s32.totalorder %v3478_v16, 0 }
 0x2d1   : > { %v1917_v37 = vshrl.u32 %v1899_v1, %v1915_v35  ;;  %v1920_v44 = vadd.s32 127, %v1919_v43  ;;  %v2006_v40 = vsel %vm2004_vm15, %v2005_v56, %v3672_v18  ;;  %vm1838_vm0 = vcmp.eq.s32.totalorder %v1833_v17, 2 }
 0x2d2   : > { %v2007_v63 = vadd.s32 %v2006_v40, %v2002_v10  ;;  %vm1835_vm1 = vcmp.eq.s32.totalorder %v1833_v17, 0  ;;  %vm1834_vm2 = vcmp.lt.s32.totalorder %v1833_v17, 2  ;;  %v1929_v50 = vsub.s32 4, %v3636_v26 }
 0x2d3   : > { %v1918_v5 = vor.u32 %v1917_v37, %v1916_v31  ;;  %v1921_v20 = vshll.u32 %v1920_v44, 23  ;;  %vm1844_vm5 = vcmp.le.f32.partialorder %v1843_v42, 0.7853982  ;;  %v2079_v23 = vmul.f32 1.442695, %v3565_v9 }
 0x2d4   : > { %v2008_v3 = vadd.s32 536870912, %v2007_v63  ;;  %v1930_v6 = vsel %vm1845_vm4, %v1929_v50, %v3636_v26  ;;  %v2003_v62 = vadd.s32 %v3671_v4, %v3680_v7  ;;  %vm1935_vm10 = vweird.f32 %v3478_v16 }
 0x2d5   : > { %v2421_v46 = vpop.eup %2420  ;;  %v1922_v30 = vor.u32 4788187, %v1921_v20  ;;  %v1925_v34 = vcvt.s32.f32 %v1918_v5  ;;  %v1932_v54 = vsel %vm1844_vm5, 0, %v1930_v6  ;;  %vm1949_vm11 = vcmp.lt.s32.totalorder %v3585_v22, 0 }
 0x2d6   : > { %v2423_v60 = vpop.eup %2422  ;;  %v1839_v29 = vxor.u32 2147483648, %v2421_v46  ;;  %v3687_v57 = vshrl.u32 %v2008_v3, 30  ;;  %v1936_v8 = vadd.s32 3, %v1932_v54  ;;  %vm1948_vm12 = vcmp.le.f32.partialorder %v1947_v36, 0.7853982 }
 0x2d7   : > { %v1836_v38 = vxor.u32 2147483648, %v2423_v60  ;;  %v1923_v14 = vand.u32 2147483647, %v1922_v30 }
 0x2d8   : > { %v1840_v32 = vsel %vm1838_vm0, %v1839_v29, %v2423_v60  ;;  %v2425_v19 = vpop.eup %2424  ;;  %v2010_v15 = vshll.u32 %v3687_v57, 30  ;;  %v1937_v21 = vand.u32 3, %v1936_v8  ;;  %v2033_v17 = vsub.s32 4, %v3687_v57 }
 0x2d9   : > { %v1837_v49 = vsel %vm1835_vm1, %v2421_v46, %v1836_v38  ;;  %v1926_v59 = vmul.f32 %v1925_v34, %v1923_v14  ;;  %vm2039_vm0 = vweird.f32 %v3585_v22 }
 0x2da   : > { %v1841_v55 = vsel %vm1834_vm2, %v1837_v49, %v1840_v32  ;;  %v2011_v12 = vsub.s32 %v2007_v63, %v2010_v15  ;;  %vm1942_vm7 = vcmp.eq.s32.totalorder %v1937_v21, 2  ;;  %vm1939_vm8 = vcmp.eq.s32.totalorder %v1937_v21, 0 }
 0x2db   : > { %v1842_v33 = vsel %vm1831_vm3, nan, %v1841_v55  ;;  %v1927_v28 = vxor.u32 2147483648, %v1926_v59  ;;  %vm1938_vm9 = vcmp.lt.s32.totalorder %v1937_v21, 2  ;;  %v2034_v10 = vsel %vm1949_vm11, %v2033_v17, %v3687_v57 }
 0x2dc   : > { %v2096_v47 = vmul.f32 %v2425_v19, %v1842_v33  ;;  %v2013_v41 = vsub.s32 0, %v2011_v12  ;;  %v2036_v30 = vsel %vm1948_vm12, 0, %v2034_v10 }
 0x2dd   : > { %v1928_v52 = vsel %vm1845_vm4, %v1927_v28, %v1926_v59  ;;  %v2040_v40 = vadd.s32 3, %v2036_v30 }
 0x2de   : > { %2112 = vst [vmem:[%s2752_s25 + $0x68] sm:$0xff] %v2096_v47  ;;  %v1931_v11 = vsel %vm1844_vm5, %v3478_v16, %v1928_v52  ;;  %v2256_v53 = vmin.u32 %v2013_v41, %v2011_v12  ;;  %v384_v16 = vpop.f32.mrf.mxu1 }
 0x2df   : > { %2426 = vcosq.f32 %v1931_v11  ;;  %v2081_v46 = vmul.f32 1.442695, %v384_v16  ;;  %v2041_v60 = vand.u32 3, %v2040_v40 }
 0x2e0   : > { %2428 = vsinq.f32 %v1931_v11  ;;  %v2015_v61 = vclz %v2256_v53 }
 0x2e1   : > { %2430 = vpow2.f32 %v2079_v23  ;;  %vm2046_vm13 = vcmp.eq.s32.totalorder %v2041_v60, 2  ;;  %vm2043_vm14 = vcmp.eq.s32.totalorder %v2041_v60, 0  ;;  %vm2042_vm15 = vcmp.lt.s32.totalorder %v2041_v60, 2 }
 0x2e2   : > { %v2257_v27 = vadd.s32 4294967294, %v2015_v61 }
 0x2e4   : > { %vm2258_vm6 = vcmp.lt.s32.totalorder %v2257_v27, 0 }
 0x2e5   : > { %v2018_v42 = vsel %vm2258_vm6, 0, %v2257_v27 }
 0x2e6   : > { %v2019_v13 = vsub.s32 32, %v2018_v42  ;;  %v2023_v25 = vsub.s32 4294967266, %v2018_v42  ;;  %v2020_v26 = vshll.u32 %v2011_v12, %v2018_v42 }
 0x2e8   : > { %v2021_v0 = vshrl.u32 %v2003_v62, %v2019_v13  ;;  %v2024_v45 = vadd.s32 127, %v2023_v25 }
 0x2ea   : > { %v2022_v58 = vor.u32 %v2021_v0, %v2020_v26  ;;  %v2025_v24 = vshll.u32 %v2024_v45, 23 }
 0x2ec   : > { %v2427_v51 = vpop.eup %2426  ;;  %v2026_v43 = vor.u32 4788187, %v2025_v24  ;;  %v2029_v31 = vcvt.s32.f32 %v2022_v58 }
 0x2ed   : > { %v2429_v18 = vpop.eup %2428  ;;  %v1943_v9 = vxor.u32 2147483648, %v2427_v51 }
 0x2ee   : > { %v1940_v39 = vxor.u32 2147483648, %v2429_v18  ;;  %v2431_v48 = vpop.eup %2430  ;;  %v2027_v7 = vand.u32 2147483647, %v2026_v43 }
 0x2ef   : > { %v1944_v1 = vsel %vm1942_vm7, %v1943_v9, %v2429_v18 }
 0x2f0   : > { %v1941_v35 = vsel %vm1939_vm8, %v2427_v51, %v1940_v39  ;;  %v2030_v44 = vmul.f32 %v2029_v31, %v2027_v7 }
 0x2f1   : > { %v1945_v4 = vsel %vm1938_vm9, %v1941_v35, %v1944_v1 }
 0x2f2   : > { %v1946_v2 = vsel %vm1935_vm10, nan, %v1945_v4  ;;  %v2031_v56 = vxor.u32 2147483648, %v2030_v44 }
 0x2f3   : > { %v2097_v37 = vmul.f32 %v2431_v48, %v1946_v2 }
 0x2f4   : > { %v2032_v5 = vsel %vm1949_vm11, %v2031_v56, %v2030_v44 }
 0x2f5   : > { %2113 = vst [vmem:[%s2752_s25 + $0x70] sm:$0xff] %v2097_v37  ;;  %v2035_v20 = vsel %vm1948_vm12, %v3585_v22, %v2032_v5 }
 0x2f6   : > { %2432 = vcosq.f32 %v2035_v20 }
 0x2f7   : > { %2434 = vsinq.f32 %v2035_v20 }
 0x2f8   : > { %2436 = vpow2.f32 %v2081_v46 }
 0x303   : > { %v2433_v29 = vpop.eup %2432 }
 0x304   : > { %v2435_v63 = vpop.eup %2434  ;;  %v2047_v38 = vxor.u32 2147483648, %v2433_v29 }
 0x305   : > { %v2044_v14 = vxor.u32 2147483648, %v2435_v63  ;;  %v2437_v3 = vpop.eup %2436 }
 0x306   : > { %v2048_v36 = vsel %vm2046_vm13, %v2047_v38, %v2435_v63 }
 0x307   : > { %v2045_v34 = vsel %vm2043_vm14, %v2433_v29, %v2044_v14 }
 0x308   : > { %v2049_v32 = vsel %vm2042_vm15, %v2045_v34, %v2048_v36 }
 0x309   : > { %v2050_v49 = vsel %vm2039_vm0, nan, %v2049_v32 }
 0x30a   : > { %v2098_v59 = vmul.f32 %v2437_v3, %v2050_v49 }
 0x30c   : > { %2114 = vst [vmem:[%s2752_s25 + $0x78] sm:$0xff] %v2098_v59 }
 0x30d PF: > { %s12_s9 = sadd.s32 1, %s2444_s9  }
 0x30e   : > { %p9_p5 = scmp.ge.s32.totalorder %s12_s9, 4  }
 0x310   :  { %11 = sbr.rel (!%p9_p5) target bundleno = 1 (0x1), region = 58 }

</bundles_post_ra>
